<compile_context>
chip_gen: v7x
topology: tpu7x:2x2x1
jax: 0.10.0
libtpu: 0.0.40
codegen_flags: <defaults>
</compile_context>

<pallas_src>
import functools

import jax
import jax.numpy as jnp
from jax import lax
from jax.experimental import pallas as pl
from jax.experimental.pallas import tpu as pltpu


_VMEM_LIMIT_BYTES = 32 * 1024 * 1024     # explicit scoped-VMEM limit (safe on v5e/v6e/v7x)
_VMEM_BLOCK_BUDGET = 24 * 1024 * 1024    # working-set target when auto-picking block_batch


# ---------------------------------------------------------------------------
# packed bias slab layout: one bias / LayerNorm vector per sublane row
# ---------------------------------------------------------------------------
def _bias_layout(d, dff):
    rows = (("hg_b", d), ("qkv_b", 3 * d), ("out_b", d), ("ln1_w", d),
            ("ln1_b", d), ("lin1_b", dff), ("lin2_b", d), ("ln2_w", d),
            ("ln2_b", d))
    width = max(w for _, w in rows)
    index = {name: (i, w) for i, (name, w) in enumerate(rows)}
    return index, len(rows), width


# ---------------------------------------------------------------------------
# math (shared by the Pallas kernel body and the pure-JAX reference)
# ---------------------------------------------------------------------------
def _layernorm(x, w, b, eps=1e-5):
    mean = jnp.mean(x, axis=-1, keepdims=True)
    var = jnp.mean((x - mean) ** 2, axis=-1, keepdims=True)
    return (x - mean) * lax.rsqrt(var + eps) * w + b


def _forward_block(x, Hm, Hmt, w_hg, w_qkv, w_out_heads, w_ff1, w_ff2, bias,
                   *, nhead):
    """One batch block.

    x: (Bb, N, d) f32    Hm: (Bb, N, E) bf16    Hmt: (Bb, E, N) bf16
    weights: bf16, (in, out) layout    bias: (rows, W) f32 slab
    Returns (Bb, N, d) f32.
    """
    f32, bf16 = jnp.float32, jnp.bfloat16
    Bb, N, d = x.shape
    dff = w_ff1.shape[-1]
    hd = d // nhead
    M = Bb * N
    bias_idx, _, _ = _bias_layout(d, dff)

    def bb(name):
        row, width = bias_idx[name]
        return bias[row:row + 1, :width]                      # (1, width) row

    # ---- hypergraph mixing:  Dv^-1/2 H De^-1 H^T Dv^-1/2 @ x  --------------
    # TODO(synk): torch.linalg.pinv of the (+1e-6 regularized) diagonal degree
    # matrices is approximated by exact elementwise diagonal inversion.
    D_v = jnp.sum(Hm.astype(f32), axis=2, keepdims=True)      # (Bb, N, 1)
    D_e = jnp.sum(Hmt.astype(f32), axis=2, keepdims=True)     # (Bb, E, 1)
    dv = jnp.where(D_v > 0.0, lax.rsqrt(D_v + 1e-12), 0.0)    # EUP rsqrt
    de = jnp.where(D_e > 0.0, 1.0 / (D_e + 1e-6), 0.0)

    xs = (x * dv).astype(bf16)                                 # Dv^-1/2 x
    t = jnp.einsum("ben,bnd->bed", Hmt, xs,
                   preferred_element_type=f32)                 # H^T (Dv^-1/2 x)
    t = (t * de).astype(bf16)                                  # De^-1 (...)
    u = jnp.einsum("bne,bed->bnd", Hm, t,
                   preferred_element_type=f32)                 # H (...)
    hx = (u * dv).reshape(M, d)                                # Dv^-1/2 (...)

    # ---- flatten batch into the matmul M dimension --------------------------
    x_flat = x.reshape(M, d)

    # hypergraph conv projection
    x_hyper = jnp.dot(hx.astype(bf16), w_hg,
                      preferred_element_type=f32) + bb("hg_b")

    # fused QKV projection (softmax scale pre-folded into the Q columns/bias)
    qkv = jnp.dot(x_hyper.astype(bf16), w_qkv,
                  preferred_element_type=f32) + bb("qkv_b")
    q, k, v = qkv[:, :d], qkv[:, d:2 * d], qkv[:, 2 * d:]

    # multi-head self-attention; heads folded straight into the out-projection
    attn = None
    for h in range(nhead):                                     # static, nhead small
        lo = h * hd
        qh = q[:, lo:lo + hd].reshape(Bb, N, hd).astype(bf16)
        kh = k[:, lo:lo + hd].reshape(Bb, N, hd).astype(bf16)
        vh = v[:, lo:lo + hd].reshape(Bb, N, hd).astype(bf16)
        s = jnp.einsum("bqd,bkd->bqk", qh, kh, preferred_element_type=f32)
        s = s - jnp.max(s, axis=-1, keepdims=True)
        e = jnp.exp(s)
        p = e / jnp.sum(e, axis=-1, keepdims=True)
        ctx = jnp.einsum("bqk,bkd->bqd", p.astype(bf16), vh,
                         preferred_element_type=f32)
        head_out = jnp.dot(ctx.reshape(M, hd).astype(bf16), w_out_heads[h],
                           preferred_element_type=f32)
        attn = head_out if attn is None else attn + head_out
    attn = attn + bb("out_b")

    # residual + norm1
    x1 = _layernorm(x_flat + attn, bb("ln1_w"), bb("ln1_b"))

    # feed-forward (eval: no dropout)
    h1 = jnp.maximum(
        jnp.dot(x1.astype(bf16), w_ff1, preferred_element_type=f32)
        + bb("lin1_b"), 0.0)
    ff = jnp.dot(h1.astype(bf16), w_ff2,
                 preferred_element_type=f32) + bb("lin2_b")

    # residual + norm2
    y = _layernorm(x1 + ff, bb("ln2_w"), bb("ln2_b"))
    return y.reshape(Bb, N, d)


# ---------------------------------------------------------------------------
# Pallas kernel
# ---------------------------------------------------------------------------
def _kernel(x_ref, h_ref, ht_ref, w_hg_ref, w_qkv_ref, w_out_ref, w_ff1_ref,
            w_ff2_ref, bias_ref, o_ref, *, nhead):
    y = _forward_block(x_ref[...], h_ref[...], ht_ref[...],
                       w_hg_ref[...], w_qkv_ref[...], w_out_ref[...],
                       w_ff1_ref[...], w_ff2_ref[...], bias_ref[...],
                       nhead=nhead)
    o_ref[...] = y.astype(o_ref.dtype)


# ---------------------------------------------------------------------------
# parameter packing / block sizing / pallas_call wrapper
# ---------------------------------------------------------------------------
def _prep_params(params, nhead):
    f32 = lambda a: jnp.asarray(a, jnp.float32)
    to_bf16 = lambda a: jnp.asarray(a, jnp.float32).astype(jnp.bfloat16)

    d = params["hg_w"].shape[0]
    dff = params["lin1_w"].shape[0]
    hd = d // nhead
    scale = 1.0 / float(hd) ** 0.5                       # folded into W_q / b_q

    w_hg = to_bf16(params["hg_w"])                                   # (d, d)
    w_qkv = jnp.concatenate(
        [f32(params["wq"]).T * scale, f32(params["wk"]).T, f32(params["wv"]).T],
        axis=1).astype(jnp.bfloat16)                                 # (d, 3d)
    w_out_heads = (f32(params["out_w"]).T
                   .reshape(nhead, hd, d).astype(jnp.bfloat16))      # (nh, hd, d)
    w_ff1 = to_bf16(params["lin1_w"].T)                              # (d, dff)
    w_ff2 = to_bf16(params["lin2_w"].T)                              # (dff, d)

    pieces = {
        "hg_b": f32(params["hg_b"]),
        "qkv_b": jnp.concatenate([f32(params["bq"]) * scale, f32(params["bk"]),
                                  f32(params["bv"])]),
        "out_b": f32(params["out_b"]),
        "ln1_w": f32(params["ln1_w"]), "ln1_b": f32(params["ln1_b"]),
        "lin1_b": f32(params["lin1_b"]), "lin2_b": f32(params["lin2_b"]),
        "ln2_w": f32(params["ln2_w"]), "ln2_b": f32(params["ln2_b"]),
    }
    bias_idx, n_rows, width = _bias_layout(d, dff)
    bias = jnp.zeros((n_rows, width), jnp.float32)
    for name, (row, w) in bias_idx.items():
        bias = bias.at[row, :w].set(pieces[name])
    return w_hg, w_qkv, w_out_heads, w_ff1, w_ff2, bias


def _vmem_estimate_bytes(Bb, N, E, d, dff):
    M = Bb * N
    width = max(3 * d, dff, d)
    io = 2 * (M * d * 4 + 2 * M * E * 2 + M * d * 4)          # double-buffered x, H, Ht, out
    weights = 2 * 2 * (2 * d * d + 3 * d * d + 2 * d * dff)   # bf16, double-buffered
    bias = 2 * 4 * 9 * width
    interm = 4 * (M * (9 * d + dff) + 3 * Bb * N * N + 2 * Bb * E * d)
    return io + weights + bias + interm


def _pick_block_batch(B, N, E, d, dff, budget):
    best = 1
    for Bb in range(1, B + 1):
        if B % Bb:
            continue
        if B >= 2 and B // Bb < 2:
            # keep >= 2 grid steps so the "parallel" axis can be split across
            # both TensorCores on v7x.
            continue
        if _vmem_estimate_bytes(Bb, N, E, d, dff) <= budget:
            best = max(best, Bb)
    return best


def hypergraph_transformer_layer(X, Hm, params, *, nhead, block_batch=None):
    B, N, d = X.shape
    E = Hm.shape[-1]
    dff = params["lin1_w"].shape[0]
    assert d % nhead == 0
    w_hg, w_qkv, w_out_heads, w_ff1, w_ff2, bias = _prep_params(params, nhead)

    if block_batch is None:
        block_batch = _pick_block_batch(B, N, E, d, dff, _VMEM_BLOCK_BUDGET)
    assert B % block_batch == 0, "batch must be divisible by block_batch"
    Bb = block_batch

    X = X.astype(jnp.float32)
    H_bf = Hm.astype(jnp.bfloat16)              # incidence is 0/1: exact in bf16
    Ht_bf = jnp.swapaxes(H_bf, 1, 2)            # host-side transpose (B, E, N)

    def shared(arr):                            # grid-invariant weight / bias slab
        nd = arr.ndim
        return pl.BlockSpec(arr.shape, lambda b, _n=nd: (0,) * _n)

    in_specs = [
        pl.BlockSpec((Bb, N, d), lambda b: (b, 0, 0)),
        pl.BlockSpec((Bb, N, E), lambda b: (b, 0, 0)),
        pl.BlockSpec((Bb, E, N), lambda b: (b, 0, 0)),
        shared(w_hg), shared(w_qkv), shared(w_out_heads),
        shared(w_ff1), shared(w_ff2), shared(bias),
    ]

    return pl.pallas_call(
        functools.partial(_kernel, nhead=nhead),
        out_shape=jax.ShapeDtypeStruct((B, N, d), jnp.float32),
        grid=(B // Bb,),
        in_specs=in_specs,
        out_specs=pl.BlockSpec((Bb, N, d), lambda b: (b, 0, 0)),
        compiler_params=pltpu.CompilerParams(
            dimension_semantics=("parallel",),
            vmem_limit_bytes=_VMEM_LIMIT_BYTES),
    )(X, H_bf, Ht_bf, w_hg, w_qkv, w_out_heads, w_ff1, w_ff2, bias)


# ---------------------------------------------------------------------------
# deterministic parameter construction (shapes from the module __init__)
# ---------------------------------------------------------------------------
def init_params(key, d_model, dim_ff):
    ks = jax.random.split(key, 10)

    def uni(k, shape, fan_in):
        bound = (6.0 / fan_in) ** 0.5
        return jax.random.uniform(k, shape, jnp.float32, -bound, bound)

    in_proj_w = uni(ks[1], (3 * d_model, d_model), d_model)   # (3d, d), (out, in)
    return dict(
        hg_w=uni(ks[0], (d_model, d_model), d_model),         # (in, out)
        hg_b=jnp.zeros((d_model,), jnp.float32),
        wq=in_proj_w[:d_model],
        wk=in_proj_w[d_model:2 * d_model],
        wv=in_proj_w[2 * d_model:],
        bq=jnp.zeros((d_model,), jnp.float32),
        bk=jnp.zeros((d_model,), jnp.float32),
        bv=jnp.zeros((d_model,), jnp.float32),
        out_w=uni(ks[2], (d_model, d_model), d_model),
        out_b=jnp.zeros((d_model,), jnp.float32),
        ln1_w=jnp.ones((d_model,), jnp.float32),
        ln1_b=jnp.zeros((d_model,), jnp.float32),
        lin1_w=uni(ks[3], (dim_ff, d_model), d_model),
        lin1_b=uni(ks[4], (dim_ff,), d_model) * 0.1,
        lin2_w=uni(ks[5], (d_model, dim_ff), dim_ff),
        lin2_b=uni(ks[6], (d_model,), dim_ff) * 0.1,
        ln2_w=jnp.ones((d_model,), jnp.float32),
        ln2_b=jnp.zeros((d_model,), jnp.float32),
    )


def reference(X, Hm, params, nhead):
    """Pure-JAX reference (same math, XLA-executed) validating Pallas plumbing."""
    w_hg, w_qkv, w_out_heads, w_ff1, w_ff2, bias = _prep_params(params, nhead)
    X = X.astype(jnp.float32)
    H_bf = Hm.astype(jnp.bfloat16)
    Ht_bf = jnp.swapaxes(H_bf, 1, 2)
    return _forward_block(X, H_bf, Ht_bf, w_hg, w_qkv, w_out_heads,
                          w_ff1, w_ff2, bias, nhead=nhead)


if __name__ == "__main__":
    B, N, E = 4, 8, 8
    d_model, nhead, dim_ff = 32, 4, 64

    key = jax.random.PRNGKey(0)
    kx, kh, kp = jax.random.split(key, 3)
    X = jax.random.normal(kx, (B, N, d_model), jnp.float32)
    Hm = (jax.random.uniform(kh, (B, N, E)) > 0.5).astype(jnp.float32)
    params = init_params(kp, d_model, dim_ff)

    out = hypergraph_transformer_layer(X, Hm, params, nhead=nhead)
    out = jax.block_until_ready(out)

    ref = jax.block_until_ready(reference(X, Hm, params, nhead))
    assert out.shape == (B, N, d_model)
    assert bool(jnp.all(jnp.isfinite(out)))
    max_err = float(jnp.max(jnp.abs(out - ref)))
    assert jnp.allclose(out, ref, atol=2e-2, rtol=2e-2), max_err

    print("KERNEL_OK")
</pallas_src>

<mosaic_0001>
module attributes {stable_mosaic.version = 11 : i64} {
  func.func @_kernel(%arg0: i32, %arg1: memref<2x8x32xf32, #tpu.memory_space<vmem>>, %arg2: memref<2x8x8xbf16, #tpu.memory_space<vmem>>, %arg3: memref<2x8x8xbf16, #tpu.memory_space<vmem>>, %arg4: memref<32x32xbf16, #tpu.memory_space<vmem>>, %arg5: memref<32x96xbf16, #tpu.memory_space<vmem>>, %arg6: memref<4x8x32xbf16, #tpu.memory_space<vmem>>, %arg7: memref<32x64xbf16, #tpu.memory_space<vmem>>, %arg8: memref<64x32xbf16, #tpu.memory_space<vmem>>, %arg9: memref<9x96xf32, #tpu.memory_space<vmem>>, %arg10: memref<2x8x32xf32, #tpu.memory_space<vmem>>) attributes {dimension_semantics = [#tpu.dimension_semantics<parallel>], iteration_bounds = array<i64: 2>, scalar_prefetch = 0 : i64, scratch_operands = 0 : i64, tpu.core_type = #tpu.core_type<tc>, window_params = [{transform_indices = @transform_0, window_bounds = array<i64: 2, 8, 32>}, {transform_indices = @transform_1, window_bounds = array<i64: 2, 8, 8>}, {transform_indices = @transform_2, window_bounds = array<i64: 2, 8, 8>}, {pipeline_mode = #tpu.pipeline_mode<synchronous>, transform_indices = @transform_3, window_bounds = array<i64: 32, 32>}, {pipeline_mode = #tpu.pipeline_mode<synchronous>, transform_indices = @transform_4, window_bounds = array<i64: 32, 96>}, {pipeline_mode = #tpu.pipeline_mode<synchronous>, transform_indices = @transform_5, window_bounds = array<i64: 4, 8, 32>}, {pipeline_mode = #tpu.pipeline_mode<synchronous>, transform_indices = @transform_6, window_bounds = array<i64: 32, 64>}, {pipeline_mode = #tpu.pipeline_mode<synchronous>, transform_indices = @transform_7, window_bounds = array<i64: 64, 32>}, {pipeline_mode = #tpu.pipeline_mode<synchronous>, transform_indices = @transform_8, window_bounds = array<i64: 9, 96>}, {transform_indices = @transform_9, window_bounds = array<i64: 2, 8, 32>}]} {
    %c0 = arith.constant 0 : index
    %c0_0 = arith.constant 0 : index
    %c0_1 = arith.constant 0 : index
    %0 = vector.load %arg1[%c0, %c0_0, %c0_1] : memref<2x8x32xf32, #tpu.memory_space<vmem>>, vector<2x8x32xf32>
    %c0_2 = arith.constant 0 : index
    %c0_3 = arith.constant 0 : index
    %c0_4 = arith.constant 0 : index
    %1 = vector.load %arg2[%c0_2, %c0_3, %c0_4] : memref<2x8x8xbf16, #tpu.memory_space<vmem>>, vector<2x8x8xbf16>
    %c0_5 = arith.constant 0 : index
    %c0_6 = arith.constant 0 : index
    %c0_7 = arith.constant 0 : index
    %2 = vector.load %arg3[%c0_5, %c0_6, %c0_7] : memref<2x8x8xbf16, #tpu.memory_space<vmem>>, vector<2x8x8xbf16>
    %c0_8 = arith.constant 0 : index
    %c0_9 = arith.constant 0 : index
    %3 = vector.load %arg4[%c0_8, %c0_9] : memref<32x32xbf16, #tpu.memory_space<vmem>>, vector<32x32xbf16>
    %c0_10 = arith.constant 0 : index
    %c0_11 = arith.constant 0 : index
    %4 = vector.load %arg5[%c0_10, %c0_11] : memref<32x96xbf16, #tpu.memory_space<vmem>>, vector<32x96xbf16>
    %c0_12 = arith.constant 0 : index
    %c0_13 = arith.constant 0 : index
    %c0_14 = arith.constant 0 : index
    %5 = vector.load %arg6[%c0_12, %c0_13, %c0_14] : memref<4x8x32xbf16, #tpu.memory_space<vmem>>, vector<4x8x32xbf16>
    %c0_15 = arith.constant 0 : index
    %c0_16 = arith.constant 0 : index
    %6 = vector.load %arg7[%c0_15, %c0_16] : memref<32x64xbf16, #tpu.memory_space<vmem>>, vector<32x64xbf16>
    %c0_17 = arith.constant 0 : index
    %c0_18 = arith.constant 0 : index
    %7 = vector.load %arg8[%c0_17, %c0_18] : memref<64x32xbf16, #tpu.memory_space<vmem>>, vector<64x32xbf16>
    %c0_19 = arith.constant 0 : index
    %c0_20 = arith.constant 0 : index
    %8 = vector.load %arg9[%c0_19, %c0_20] : memref<9x96xf32, #tpu.memory_space<vmem>>, vector<9x96xf32>
    %9 = arith.extf %1 : vector<2x8x8xbf16> to vector<2x8x8xf32>
    %cst = arith.constant dense<0.000000e+00> : vector<2x8xf32>
    %10 = vector.multi_reduction <add>, %9, %cst [2] : vector<2x8x8xf32> to vector<2x8xf32>
    %11 = vector.shape_cast %10 : vector<2x8xf32> to vector<2x8x1xf32>
    %12 = arith.extf %2 : vector<2x8x8xbf16> to vector<2x8x8xf32>
    %cst_21 = arith.constant dense<0.000000e+00> : vector<2x8xf32>
    %13 = vector.multi_reduction <add>, %12, %cst_21 [2] : vector<2x8x8xf32> to vector<2x8xf32>
    %14 = vector.shape_cast %13 : vector<2x8xf32> to vector<2x8x1xf32>
    %cst_22 = arith.constant 0.000000e+00 : f32
    %15 = vector.broadcast %cst_22 : f32 to vector<2x8x1xf32>
    %16 = arith.cmpf ogt, %11, %15 : vector<2x8x1xf32>
    %cst_23 = arith.constant 9.99999996E-13 : f32
    %17 = vector.broadcast %cst_23 : f32 to vector<2x8x1xf32>
    %18 = arith.addf %11, %17 : vector<2x8x1xf32>
    %19 = math.rsqrt %18 : vector<2x8x1xf32>
    %cst_24 = arith.constant 0.000000e+00 : f32
    %20 = vector.broadcast %cst_24 : f32 to vector<2x8x1xf32>
    %21 = arith.select %16, %19, %20 : vector<2x8x1xi1>, vector<2x8x1xf32>
    %cst_25 = arith.constant 0.000000e+00 : f32
    %22 = vector.broadcast %cst_25 : f32 to vector<2x8x1xf32>
    %23 = arith.cmpf ogt, %14, %22 : vector<2x8x1xf32>
    %cst_26 = arith.constant 9.99999997E-7 : f32
    %24 = vector.broadcast %cst_26 : f32 to vector<2x8x1xf32>
    %25 = arith.addf %14, %24 : vector<2x8x1xf32>
    %cst_27 = arith.constant 1.000000e+00 : f32
    %26 = vector.broadcast %cst_27 : f32 to vector<2x8x1xf32>
    %27 = arith.divf %26, %25 : vector<2x8x1xf32>
    %cst_28 = arith.constant 0.000000e+00 : f32
    %28 = vector.broadcast %cst_28 : f32 to vector<2x8x1xf32>
    %29 = arith.select %23, %27, %28 : vector<2x8x1xi1>, vector<2x8x1xf32>
    %30 = vector.broadcast %21 : vector<2x8x1xf32> to vector<2x8x32xf32>
    %31 = arith.mulf %0, %30 : vector<2x8x32xf32>
    %32 = arith.truncf %31 : vector<2x8x32xf32> to vector<2x8x32xbf16>
    "tpu.trace_start"() <{level = 10 : i32, message = "ben,bnd->bed"}> : () -> ()
    %cst_29 = arith.constant dense<0.000000e+00> : vector<2x8x32xf32>
    %33 = tpu.matmul %2, %32, %cst_29 {dimension_numbers = #tpu.dot_dimension_numbers<[2], [1], [1], [2], [0, 0, 0, 1, 1, 2], [0], [0]>} : vector<2x8x8xbf16>, vector<2x8x32xbf16>, vector<2x8x32xf32> -> vector<2x8x32xf32>
    "tpu.trace_stop"() : () -> ()
    %34 = vector.broadcast %29 : vector<2x8x1xf32> to vector<2x8x32xf32>
    %35 = arith.mulf %33, %34 : vector<2x8x32xf32>
    %36 = arith.truncf %35 : vector<2x8x32xf32> to vector<2x8x32xbf16>
    "tpu.trace_start"() <{level = 10 : i32, message = "bne,bed->bnd"}> : () -> ()
    %cst_30 = arith.constant dense<0.000000e+00> : vector<2x8x32xf32>
    %37 = tpu.matmul %1, %36, %cst_30 {dimension_numbers = #tpu.dot_dimension_numbers<[2], [1], [1], [2], [0, 0, 0, 1, 1, 2], [0], [0]>} : vector<2x8x8xbf16>, vector<2x8x32xbf16>, vector<2x8x32xf32> -> vector<2x8x32xf32>
    "tpu.trace_stop"() : () -> ()
    %38 = vector.broadcast %21 : vector<2x8x1xf32> to vector<2x8x32xf32>
    %39 = arith.mulf %37, %38 : vector<2x8x32xf32>
    %40 = vector.shape_cast %39 : vector<2x8x32xf32> to vector<16x32xf32>
    %41 = vector.shape_cast %0 : vector<2x8x32xf32> to vector<16x32xf32>
    %42 = arith.truncf %40 : vector<16x32xf32> to vector<16x32xbf16>
    %cst_31 = arith.constant dense<0.000000e+00> : vector<16x32xf32>
    %43 = tpu.matmul %42, %3, %cst_31 {dimension_numbers = #tpu.dot_dimension_numbers<[1], [0], [0], [1], [0, 0, 1, 1], [], []>} : vector<16x32xbf16>, vector<32x32xbf16>, vector<16x32xf32> -> vector<16x32xf32>
    %44 = vector.extract_strided_slice %8 {offsets = [0, 0], sizes = [1, 32], strides = [1, 1]} : vector<9x96xf32> to vector<1x32xf32>
    %45 = vector.broadcast %44 : vector<1x32xf32> to vector<16x32xf32>
    %46 = arith.addf %43, %45 : vector<16x32xf32>
    %47 = arith.truncf %46 : vector<16x32xf32> to vector<16x32xbf16>
    %cst_32 = arith.constant dense<0.000000e+00> : vector<16x96xf32>
    %48 = tpu.matmul %47, %4, %cst_32 {dimension_numbers = #tpu.dot_dimension_numbers<[1], [0], [0], [1], [0, 0, 1, 1], [], []>} : vector<16x32xbf16>, vector<32x96xbf16>, vector<16x96xf32> -> vector<16x96xf32>
    %49 = vector.extract_strided_slice %8 {offsets = [1, 0], sizes = [1, 96], strides = [1, 1]} : vector<9x96xf32> to vector<1x96xf32>
    %50 = vector.broadcast %49 : vector<1x96xf32> to vector<16x96xf32>
    %51 = arith.addf %48, %50 : vector<16x96xf32>
    %52 = vector.extract_strided_slice %51 {offsets = [0, 0], sizes = [16, 32], strides = [1, 1]} : vector<16x96xf32> to vector<16x32xf32>
    %53 = vector.extract_strided_slice %51 {offsets = [0, 32], sizes = [16, 32], strides = [1, 1]} : vector<16x96xf32> to vector<16x32xf32>
    %54 = vector.extract_strided_slice %51 {offsets = [0, 64], sizes = [16, 32], strides = [1, 1]} : vector<16x96xf32> to vector<16x32xf32>
    %55 = vector.extract_strided_slice %52 {offsets = [0, 0], sizes = [16, 8], strides = [1, 1]} : vector<16x32xf32> to vector<16x8xf32>
    %56 = vector.shape_cast %55 : vector<16x8xf32> to vector<2x8x8xf32>
    %57 = arith.truncf %56 : vector<2x8x8xf32> to vector<2x8x8xbf16>
    %58 = vector.extract_strided_slice %53 {offsets = [0, 0], sizes = [16, 8], strides = [1, 1]} : vector<16x32xf32> to vector<16x8xf32>
    %59 = vector.shape_cast %58 : vector<16x8xf32> to vector<2x8x8xf32>
    %60 = arith.truncf %59 : vector<2x8x8xf32> to vector<2x8x8xbf16>
    %61 = vector.extract_strided_slice %54 {offsets = [0, 0], sizes = [16, 8], strides = [1, 1]} : vector<16x32xf32> to vector<16x8xf32>
    %62 = vector.shape_cast %61 : vector<16x8xf32> to vector<2x8x8xf32>
    %63 = arith.truncf %62 : vector<2x8x8xf32> to vector<2x8x8xbf16>
    "tpu.trace_start"() <{level = 10 : i32, message = "bqd,bkd->bqk"}> : () -> ()
    %cst_33 = arith.constant dense<0.000000e+00> : vector<2x8x8xf32>
    %64 = tpu.matmul %57, %60, %cst_33 {dimension_numbers = #tpu.dot_dimension_numbers<[2], [2], [1], [1], [0, 0, 0, 1, 1, 1], [0], [0]>} : vector<2x8x8xbf16>, vector<2x8x8xbf16>, vector<2x8x8xf32> -> vector<2x8x8xf32>
    "tpu.trace_stop"() : () -> ()
    %cst_34 = arith.constant dense<0xFF800000> : vector<2x8xf32>
    %65 = vector.multi_reduction <maximumf>, %64, %cst_34 [2] : vector<2x8x8xf32> to vector<2x8xf32>
    %66 = vector.shape_cast %65 : vector<2x8xf32> to vector<2x8x1xf32>
    %67 = vector.broadcast %66 : vector<2x8x1xf32> to vector<2x8x8xf32>
    %68 = arith.subf %64, %67 : vector<2x8x8xf32>
    %69 = math.exp %68 : vector<2x8x8xf32>
    %cst_35 = arith.constant dense<0.000000e+00> : vector<2x8xf32>
    %70 = vector.multi_reduction <add>, %69, %cst_35 [2] : vector<2x8x8xf32> to vector<2x8xf32>
    %71 = vector.shape_cast %70 : vector<2x8xf32> to vector<2x8x1xf32>
    %72 = vector.broadcast %71 : vector<2x8x1xf32> to vector<2x8x8xf32>
    %73 = arith.divf %69, %72 : vector<2x8x8xf32>
    %74 = arith.truncf %73 : vector<2x8x8xf32> to vector<2x8x8xbf16>
    "tpu.trace_start"() <{level = 10 : i32, message = "bqk,bkd->bqd"}> : () -> ()
    %cst_36 = arith.constant dense<0.000000e+00> : vector<2x8x8xf32>
    %75 = tpu.matmul %74, %63, %cst_36 {dimension_numbers = #tpu.dot_dimension_numbers<[2], [1], [1], [2], [0, 0, 0, 1, 1, 2], [0], [0]>} : vector<2x8x8xbf16>, vector<2x8x8xbf16>, vector<2x8x8xf32> -> vector<2x8x8xf32>
    "tpu.trace_stop"() : () -> ()
    %76 = vector.shape_cast %75 : vector<2x8x8xf32> to vector<16x8xf32>
    %77 = arith.truncf %76 : vector<16x8xf32> to vector<16x8xbf16>
    %78 = vector.extract_strided_slice %5 {offsets = [0, 0, 0], sizes = [1, 8, 32], strides = [1, 1, 1]} : vector<4x8x32xbf16> to vector<1x8x32xbf16>
    %79 = vector.shape_cast %78 : vector<1x8x32xbf16> to vector<8x32xbf16>
    %cst_37 = arith.constant dense<0.000000e+00> : vector<16x32xf32>
    %80 = tpu.matmul %77, %79, %cst_37 {dimension_numbers = #tpu.dot_dimension_numbers<[1], [0], [0], [1], [0, 0, 1, 1], [], []>} : vector<16x8xbf16>, vector<8x32xbf16>, vector<16x32xf32> -> vector<16x32xf32>
    %81 = vector.extract_strided_slice %52 {offsets = [0, 8], sizes = [16, 8], strides = [1, 1]} : vector<16x32xf32> to vector<16x8xf32>
    %82 = vector.shape_cast %81 : vector<16x8xf32> to vector<2x8x8xf32>
    %83 = arith.truncf %82 : vector<2x8x8xf32> to vector<2x8x8xbf16>
    %84 = vector.extract_strided_slice %53 {offsets = [0, 8], sizes = [16, 8], strides = [1, 1]} : vector<16x32xf32> to vector<16x8xf32>
    %85 = vector.shape_cast %84 : vector<16x8xf32> to vector<2x8x8xf32>
    %86 = arith.truncf %85 : vector<2x8x8xf32> to vector<2x8x8xbf16>
    %87 = vector.extract_strided_slice %54 {offsets = [0, 8], sizes = [16, 8], strides = [1, 1]} : vector<16x32xf32> to vector<16x8xf32>
    %88 = vector.shape_cast %87 : vector<16x8xf32> to vector<2x8x8xf32>
    %89 = arith.truncf %88 : vector<2x8x8xf32> to vector<2x8x8xbf16>
    "tpu.trace_start"() <{level = 10 : i32, message = "bqd,bkd->bqk"}> : () -> ()
    %cst_38 = arith.constant dense<0.000000e+00> : vector<2x8x8xf32>
    %90 = tpu.matmul %83, %86, %cst_38 {dimension_numbers = #tpu.dot_dimension_numbers<[2], [2], [1], [1], [0, 0, 0, 1, 1, 1], [0], [0]>} : vector<2x8x8xbf16>, vector<2x8x8xbf16>, vector<2x8x8xf32> -> vector<2x8x8xf32>
    "tpu.trace_stop"() : () -> ()
    %cst_39 = arith.constant dense<0xFF800000> : vector<2x8xf32>
    %91 = vector.multi_reduction <maximumf>, %90, %cst_39 [2] : vector<2x8x8xf32> to vector<2x8xf32>
    %92 = vector.shape_cast %91 : vector<2x8xf32> to vector<2x8x1xf32>
    %93 = vector.broadcast %92 : vector<2x8x1xf32> to vector<2x8x8xf32>
    %94 = arith.subf %90, %93 : vector<2x8x8xf32>
    %95 = math.exp %94 : vector<2x8x8xf32>
    %cst_40 = arith.constant dense<0.000000e+00> : vector<2x8xf32>
    %96 = vector.multi_reduction <add>, %95, %cst_40 [2] : vector<2x8x8xf32> to vector<2x8xf32>
    %97 = vector.shape_cast %96 : vector<2x8xf32> to vector<2x8x1xf32>
    %98 = vector.broadcast %97 : vector<2x8x1xf32> to vector<2x8x8xf32>
    %99 = arith.divf %95, %98 : vector<2x8x8xf32>
    %100 = arith.truncf %99 : vector<2x8x8xf32> to vector<2x8x8xbf16>
    "tpu.trace_start"() <{level = 10 : i32, message = "bqk,bkd->bqd"}> : () -> ()
    %cst_41 = arith.constant dense<0.000000e+00> : vector<2x8x8xf32>
    %101 = tpu.matmul %100, %89, %cst_41 {dimension_numbers = #tpu.dot_dimension_numbers<[2], [1], [1], [2], [0, 0, 0, 1, 1, 2], [0], [0]>} : vector<2x8x8xbf16>, vector<2x8x8xbf16>, vector<2x8x8xf32> -> vector<2x8x8xf32>
    "tpu.trace_stop"() : () -> ()
    %102 = vector.shape_cast %101 : vector<2x8x8xf32> to vector<16x8xf32>
    %103 = arith.truncf %102 : vector<16x8xf32> to vector<16x8xbf16>
    %104 = vector.extract_strided_slice %5 {offsets = [1, 0, 0], sizes = [1, 8, 32], strides = [1, 1, 1]} : vector<4x8x32xbf16> to vector<1x8x32xbf16>
    %105 = vector.shape_cast %104 : vector<1x8x32xbf16> to vector<8x32xbf16>
    %cst_42 = arith.constant dense<0.000000e+00> : vector<16x32xf32>
    %106 = tpu.matmul %103, %105, %cst_42 {dimension_numbers = #tpu.dot_dimension_numbers<[1], [0], [0], [1], [0, 0, 1, 1], [], []>} : vector<16x8xbf16>, vector<8x32xbf16>, vector<16x32xf32> -> vector<16x32xf32>
    %107 = arith.addf %80, %106 : vector<16x32xf32>
    %108 = vector.extract_strided_slice %52 {offsets = [0, 16], sizes = [16, 8], strides = [1, 1]} : vector<16x32xf32> to vector<16x8xf32>
    %109 = vector.shape_cast %108 : vector<16x8xf32> to vector<2x8x8xf32>
    %110 = arith.truncf %109 : vector<2x8x8xf32> to vector<2x8x8xbf16>
    %111 = vector.extract_strided_slice %53 {offsets = [0, 16], sizes = [16, 8], strides = [1, 1]} : vector<16x32xf32> to vector<16x8xf32>
    %112 = vector.shape_cast %111 : vector<16x8xf32> to vector<2x8x8xf32>
    %113 = arith.truncf %112 : vector<2x8x8xf32> to vector<2x8x8xbf16>
    %114 = vector.extract_strided_slice %54 {offsets = [0, 16], sizes = [16, 8], strides = [1, 1]} : vector<16x32xf32> to vector<16x8xf32>
    %115 = vector.shape_cast %114 : vector<16x8xf32> to vector<2x8x8xf32>
    %116 = arith.truncf %115 : vector<2x8x8xf32> to vector<2x8x8xbf16>
    "tpu.trace_start"() <{level = 10 : i32, message = "bqd,bkd->bqk"}> : () -> ()
    %cst_43 = arith.constant dense<0.000000e+00> : vector<2x8x8xf32>
    %117 = tpu.matmul %110, %113, %cst_43 {dimension_numbers = #tpu.dot_dimension_numbers<[2], [2], [1], [1], [0, 0, 0, 1, 1, 1], [0], [0]>} : vector<2x8x8xbf16>, vector<2x8x8xbf16>, vector<2x8x8xf32> -> vector<2x8x8xf32>
    "tpu.trace_stop"() : () -> ()
    %cst_44 = arith.constant dense<0xFF800000> : vector<2x8xf32>
    %118 = vector.multi_reduction <maximumf>, %117, %cst_44 [2] : vector<2x8x8xf32> to vector<2x8xf32>
    %119 = vector.shape_cast %118 : vector<2x8xf32> to vector<2x8x1xf32>
    %120 = vector.broadcast %119 : vector<2x8x1xf32> to vector<2x8x8xf32>
    %121 = arith.subf %117, %120 : vector<2x8x8xf32>
    %122 = math.exp %121 : vector<2x8x8xf32>
    %cst_45 = arith.constant dense<0.000000e+00> : vector<2x8xf32>
    %123 = vector.multi_reduction <add>, %122, %cst_45 [2] : vector<2x8x8xf32> to vector<2x8xf32>
    %124 = vector.shape_cast %123 : vector<2x8xf32> to vector<2x8x1xf32>
    %125 = vector.broadcast %124 : vector<2x8x1xf32> to vector<2x8x8xf32>
    %126 = arith.divf %122, %125 : vector<2x8x8xf32>
    %127 = arith.truncf %126 : vector<2x8x8xf32> to vector<2x8x8xbf16>
    "tpu.trace_start"() <{level = 10 : i32, message = "bqk,bkd->bqd"}> : () -> ()
    %cst_46 = arith.constant dense<0.000000e+00> : vector<2x8x8xf32>
    %128 = tpu.matmul %127, %116, %cst_46 {dimension_numbers = #tpu.dot_dimension_numbers<[2], [1], [1], [2], [0, 0, 0, 1, 1, 2], [0], [0]>} : vector<2x8x8xbf16>, vector<2x8x8xbf16>, vector<2x8x8xf32> -> vector<2x8x8xf32>
    "tpu.trace_stop"() : () -> ()
    %129 = vector.shape_cast %128 : vector<2x8x8xf32> to vector<16x8xf32>
    %130 = arith.truncf %129 : vector<16x8xf32> to vector<16x8xbf16>
    %131 = vector.extract_strided_slice %5 {offsets = [2, 0, 0], sizes = [1, 8, 32], strides = [1, 1, 1]} : vector<4x8x32xbf16> to vector<1x8x32xbf16>
    %132 = vector.shape_cast %131 : vector<1x8x32xbf16> to vector<8x32xbf16>
    %cst_47 = arith.constant dense<0.000000e+00> : vector<16x32xf32>
    %133 = tpu.matmul %130, %132, %cst_47 {dimension_numbers = #tpu.dot_dimension_numbers<[1], [0], [0], [1], [0, 0, 1, 1], [], []>} : vector<16x8xbf16>, vector<8x32xbf16>, vector<16x32xf32> -> vector<16x32xf32>
    %134 = arith.addf %107, %133 : vector<16x32xf32>
    %135 = vector.extract_strided_slice %52 {offsets = [0, 24], sizes = [16, 8], strides = [1, 1]} : vector<16x32xf32> to vector<16x8xf32>
    %136 = vector.shape_cast %135 : vector<16x8xf32> to vector<2x8x8xf32>
    %137 = arith.truncf %136 : vector<2x8x8xf32> to vector<2x8x8xbf16>
    %138 = vector.extract_strided_slice %53 {offsets = [0, 24], sizes = [16, 8], strides = [1, 1]} : vector<16x32xf32> to vector<16x8xf32>
    %139 = vector.shape_cast %138 : vector<16x8xf32> to vector<2x8x8xf32>
    %140 = arith.truncf %139 : vector<2x8x8xf32> to vector<2x8x8xbf16>
    %141 = vector.extract_strided_slice %54 {offsets = [0, 24], sizes = [16, 8], strides = [1, 1]} : vector<16x32xf32> to vector<16x8xf32>
    %142 = vector.shape_cast %141 : vector<16x8xf32> to vector<2x8x8xf32>
    %143 = arith.truncf %142 : vector<2x8x8xf32> to vector<2x8x8xbf16>
    "tpu.trace_start"() <{level = 10 : i32, message = "bqd,bkd->bqk"}> : () -> ()
    %cst_48 = arith.constant dense<0.000000e+00> : vector<2x8x8xf32>
    %144 = tpu.matmul %137, %140, %cst_48 {dimension_numbers = #tpu.dot_dimension_numbers<[2], [2], [1], [1], [0, 0, 0, 1, 1, 1], [0], [0]>} : vector<2x8x8xbf16>, vector<2x8x8xbf16>, vector<2x8x8xf32> -> vector<2x8x8xf32>
    "tpu.trace_stop"() : () -> ()
    %cst_49 = arith.constant dense<0xFF800000> : vector<2x8xf32>
    %145 = vector.multi_reduction <maximumf>, %144, %cst_49 [2] : vector<2x8x8xf32> to vector<2x8xf32>
    %146 = vector.shape_cast %145 : vector<2x8xf32> to vector<2x8x1xf32>
    %147 = vector.broadcast %146 : vector<2x8x1xf32> to vector<2x8x8xf32>
    %148 = arith.subf %144, %147 : vector<2x8x8xf32>
    %149 = math.exp %148 : vector<2x8x8xf32>
    %cst_50 = arith.constant dense<0.000000e+00> : vector<2x8xf32>
    %150 = vector.multi_reduction <add>, %149, %cst_50 [2] : vector<2x8x8xf32> to vector<2x8xf32>
    %151 = vector.shape_cast %150 : vector<2x8xf32> to vector<2x8x1xf32>
    %152 = vector.broadcast %151 : vector<2x8x1xf32> to vector<2x8x8xf32>
    %153 = arith.divf %149, %152 : vector<2x8x8xf32>
    %154 = arith.truncf %153 : vector<2x8x8xf32> to vector<2x8x8xbf16>
    "tpu.trace_start"() <{level = 10 : i32, message = "bqk,bkd->bqd"}> : () -> ()
    %cst_51 = arith.constant dense<0.000000e+00> : vector<2x8x8xf32>
    %155 = tpu.matmul %154, %143, %cst_51 {dimension_numbers = #tpu.dot_dimension_numbers<[2], [1], [1], [2], [0, 0, 0, 1, 1, 2], [0], [0]>} : vector<2x8x8xbf16>, vector<2x8x8xbf16>, vector<2x8x8xf32> -> vector<2x8x8xf32>
    "tpu.trace_stop"() : () -> ()
    %156 = vector.shape_cast %155 : vector<2x8x8xf32> to vector<16x8xf32>
    %157 = arith.truncf %156 : vector<16x8xf32> to vector<16x8xbf16>
    %158 = vector.extract_strided_slice %5 {offsets = [3, 0, 0], sizes = [1, 8, 32], strides = [1, 1, 1]} : vector<4x8x32xbf16> to vector<1x8x32xbf16>
    %159 = vector.shape_cast %158 : vector<1x8x32xbf16> to vector<8x32xbf16>
    %cst_52 = arith.constant dense<0.000000e+00> : vector<16x32xf32>
    %160 = tpu.matmul %157, %159, %cst_52 {dimension_numbers = #tpu.dot_dimension_numbers<[1], [0], [0], [1], [0, 0, 1, 1], [], []>} : vector<16x8xbf16>, vector<8x32xbf16>, vector<16x32xf32> -> vector<16x32xf32>
    %161 = arith.addf %134, %160 : vector<16x32xf32>
    %162 = vector.extract_strided_slice %8 {offsets = [2, 0], sizes = [1, 32], strides = [1, 1]} : vector<9x96xf32> to vector<1x32xf32>
    %163 = vector.broadcast %162 : vector<1x32xf32> to vector<16x32xf32>
    %164 = arith.addf %161, %163 : vector<16x32xf32>
    %165 = arith.addf %41, %164 : vector<16x32xf32>
    %166 = vector.extract_strided_slice %8 {offsets = [3, 0], sizes = [1, 32], strides = [1, 1]} : vector<9x96xf32> to vector<1x32xf32>
    %167 = vector.extract_strided_slice %8 {offsets = [4, 0], sizes = [1, 32], strides = [1, 1]} : vector<9x96xf32> to vector<1x32xf32>
    %cst_53 = arith.constant dense<0.000000e+00> : vector<16xf32>
    %168 = vector.multi_reduction <add>, %165, %cst_53 [1] : vector<16x32xf32> to vector<16xf32>
    %169 = vector.shape_cast %168 : vector<16xf32> to vector<16x1xf32>
    %cst_54 = arith.constant 3.200000e+01 : f32
    %170 = vector.broadcast %cst_54 : f32 to vector<16x1xf32>
    %171 = arith.divf %169, %170 : vector<16x1xf32>
    %172 = vector.broadcast %171 : vector<16x1xf32> to vector<16x32xf32>
    %173 = arith.subf %165, %172 : vector<16x32xf32>
    %174 = arith.mulf %173, %173 : vector<16x32xf32>
    %cst_55 = arith.constant dense<0.000000e+00> : vector<16xf32>
    %175 = vector.multi_reduction <add>, %174, %cst_55 [1] : vector<16x32xf32> to vector<16xf32>
    %176 = vector.shape_cast %175 : vector<16xf32> to vector<16x1xf32>
    %cst_56 = arith.constant 3.200000e+01 : f32
    %177 = vector.broadcast %cst_56 : f32 to vector<16x1xf32>
    %178 = arith.divf %176, %177 : vector<16x1xf32>
    %179 = vector.broadcast %171 : vector<16x1xf32> to vector<16x32xf32>
    %180 = arith.subf %165, %179 : vector<16x32xf32>
    %cst_57 = arith.constant 9.99999974E-6 : f32
    %181 = vector.broadcast %cst_57 : f32 to vector<16x1xf32>
    %182 = arith.addf %178, %181 : vector<16x1xf32>
    %183 = math.rsqrt %182 : vector<16x1xf32>
    %184 = vector.broadcast %183 : vector<16x1xf32> to vector<16x32xf32>
    %185 = arith.mulf %180, %184 : vector<16x32xf32>
    %186 = vector.broadcast %166 : vector<1x32xf32> to vector<16x32xf32>
    %187 = arith.mulf %185, %186 : vector<16x32xf32>
    %188 = vector.broadcast %167 : vector<1x32xf32> to vector<16x32xf32>
    %189 = arith.addf %187, %188 : vector<16x32xf32>
    %190 = arith.truncf %189 : vector<16x32xf32> to vector<16x32xbf16>
    %cst_58 = arith.constant dense<0.000000e+00> : vector<16x64xf32>
    %191 = tpu.matmul %190, %6, %cst_58 {dimension_numbers = #tpu.dot_dimension_numbers<[1], [0], [0], [1], [0, 0, 1, 1], [], []>} : vector<16x32xbf16>, vector<32x64xbf16>, vector<16x64xf32> -> vector<16x64xf32>
    %192 = vector.extract_strided_slice %8 {offsets = [5, 0], sizes = [1, 64], strides = [1, 1]} : vector<9x96xf32> to vector<1x64xf32>
    %193 = vector.broadcast %192 : vector<1x64xf32> to vector<16x64xf32>
    %194 = arith.addf %191, %193 : vector<16x64xf32>
    %cst_59 = arith.constant 0.000000e+00 : f32
    %195 = vector.broadcast %cst_59 : f32 to vector<16x64xf32>
    %196 = arith.maximumf %194, %195 : vector<16x64xf32>
    %197 = arith.truncf %196 : vector<16x64xf32> to vector<16x64xbf16>
    %cst_60 = arith.constant dense<0.000000e+00> : vector<16x32xf32>
    %198 = tpu.matmul %197, %7, %cst_60 {dimension_numbers = #tpu.dot_dimension_numbers<[1], [0], [0], [1], [0, 0, 1, 1], [], []>} : vector<16x64xbf16>, vector<64x32xbf16>, vector<16x32xf32> -> vector<16x32xf32>
    %199 = vector.extract_strided_slice %8 {offsets = [6, 0], sizes = [1, 32], strides = [1, 1]} : vector<9x96xf32> to vector<1x32xf32>
    %200 = vector.broadcast %199 : vector<1x32xf32> to vector<16x32xf32>
    %201 = arith.addf %198, %200 : vector<16x32xf32>
    %202 = arith.addf %189, %201 : vector<16x32xf32>
    %203 = vector.extract_strided_slice %8 {offsets = [7, 0], sizes = [1, 32], strides = [1, 1]} : vector<9x96xf32> to vector<1x32xf32>
    %204 = vector.extract_strided_slice %8 {offsets = [8, 0], sizes = [1, 32], strides = [1, 1]} : vector<9x96xf32> to vector<1x32xf32>
    %cst_61 = arith.constant dense<0.000000e+00> : vector<16xf32>
    %205 = vector.multi_reduction <add>, %202, %cst_61 [1] : vector<16x32xf32> to vector<16xf32>
    %206 = vector.shape_cast %205 : vector<16xf32> to vector<16x1xf32>
    %cst_62 = arith.constant 3.200000e+01 : f32
    %207 = vector.broadcast %cst_62 : f32 to vector<16x1xf32>
    %208 = arith.divf %206, %207 : vector<16x1xf32>
    %209 = vector.broadcast %208 : vector<16x1xf32> to vector<16x32xf32>
    %210 = arith.subf %202, %209 : vector<16x32xf32>
    %211 = arith.mulf %210, %210 : vector<16x32xf32>
    %cst_63 = arith.constant dense<0.000000e+00> : vector<16xf32>
    %212 = vector.multi_reduction <add>, %211, %cst_63 [1] : vector<16x32xf32> to vector<16xf32>
    %213 = vector.shape_cast %212 : vector<16xf32> to vector<16x1xf32>
    %cst_64 = arith.constant 3.200000e+01 : f32
    %214 = vector.broadcast %cst_64 : f32 to vector<16x1xf32>
    %215 = arith.divf %213, %214 : vector<16x1xf32>
    %216 = vector.broadcast %208 : vector<16x1xf32> to vector<16x32xf32>
    %217 = arith.subf %202, %216 : vector<16x32xf32>
    %cst_65 = arith.constant 9.99999974E-6 : f32
    %218 = vector.broadcast %cst_65 : f32 to vector<16x1xf32>
    %219 = arith.addf %215, %218 : vector<16x1xf32>
    %220 = math.rsqrt %219 : vector<16x1xf32>
    %221 = vector.broadcast %220 : vector<16x1xf32> to vector<16x32xf32>
    %222 = arith.mulf %217, %221 : vector<16x32xf32>
    %223 = vector.broadcast %203 : vector<1x32xf32> to vector<16x32xf32>
    %224 = arith.mulf %222, %223 : vector<16x32xf32>
    %225 = vector.broadcast %204 : vector<1x32xf32> to vector<16x32xf32>
    %226 = arith.addf %224, %225 : vector<16x32xf32>
    %227 = vector.shape_cast %226 : vector<16x32xf32> to vector<2x8x32xf32>
    %c0_66 = arith.constant 0 : index
    %c0_67 = arith.constant 0 : index
    %c0_68 = arith.constant 0 : index
    %228 = vector.load %arg10[%c0_66, %c0_67, %c0_68] : memref<2x8x32xf32, #tpu.memory_space<vmem>>, vector<2x8x32xf32>
    tpu.vector_store %arg10[%c0_66, %c0_67, %c0_68], %227 {strides = array<i32>} : memref<2x8x32xf32, #tpu.memory_space<vmem>>, vector<2x8x32xf32>,
    return
  }
  func.func @transform_0(%arg0: i32) -> (i32, i32, i32) {
    %c0_i32 = arith.constant 0 : i32
    %c0_i32_0 = arith.constant 0 : i32
    %c0_i32_1 = arith.constant 0 : i32
    return %arg0, %c0_i32, %c0_i32_0 : i32, i32, i32
  }
  func.func @transform_1(%arg0: i32) -> (i32, i32, i32) {
    %c0_i32 = arith.constant 0 : i32
    %c0_i32_0 = arith.constant 0 : i32
    %c0_i32_1 = arith.constant 0 : i32
    return %arg0, %c0_i32, %c0_i32_0 : i32, i32, i32
  }
  func.func @transform_2(%arg0: i32) -> (i32, i32, i32) {
    %c0_i32 = arith.constant 0 : i32
    %c0_i32_0 = arith.constant 0 : i32
    %c0_i32_1 = arith.constant 0 : i32
    return %arg0, %c0_i32, %c0_i32_0 : i32, i32, i32
  }
  func.func @transform_3(%arg0: i32) -> (i32, i32) {
    %c0_i32 = arith.constant 0 : i32
    %c0_i32_0 = arith.constant 0 : i32
    %c0_i32_1 = arith.constant 0 : i32
    return %c0_i32, %c0_i32_0 : i32, i32
  }
  func.func @transform_4(%arg0: i32) -> (i32, i32) {
    %c0_i32 = arith.constant 0 : i32
    %c0_i32_0 = arith.constant 0 : i32
    %c0_i32_1 = arith.constant 0 : i32
    return %c0_i32, %c0_i32_0 : i32, i32
  }
  func.func @transform_5(%arg0: i32) -> (i32, i32, i32) {
    %c0_i32 = arith.constant 0 : i32
    %c0_i32_0 = arith.constant 0 : i32
    %c0_i32_1 = arith.constant 0 : i32
    %c0_i32_2 = arith.constant 0 : i32
    return %c0_i32, %c0_i32_0, %c0_i32_1 : i32, i32, i32
  }
  func.func @transform_6(%arg0: i32) -> (i32, i32) {
    %c0_i32 = arith.constant 0 : i32
    %c0_i32_0 = arith.constant 0 : i32
    %c0_i32_1 = arith.constant 0 : i32
    return %c0_i32, %c0_i32_0 : i32, i32
  }
  func.func @transform_7(%arg0: i32) -> (i32, i32) {
    %c0_i32 = arith.constant 0 : i32
    %c0_i32_0 = arith.constant 0 : i32
    %c0_i32_1 = arith.constant 0 : i32
    return %c0_i32, %c0_i32_0 : i32, i32
  }
  func.func @transform_8(%arg0: i32) -> (i32, i32) {
    %c0_i32 = arith.constant 0 : i32
    %c0_i32_0 = arith.constant 0 : i32
    %c0_i32_1 = arith.constant 0 : i32
    return %c0_i32, %c0_i32_0 : i32, i32
  }
  func.func @transform_9(%arg0: i32) -> (i32, i32, i32) {
    %c0_i32 = arith.constant 0 : i32
    %c0_i32_0 = arith.constant 0 : i32
    %c0_i32_1 = arith.constant 0 : i32
    return %arg0, %c0_i32, %c0_i32_0 : i32, i32, i32
  }
}

</mosaic_0001>

<bundles_post_ra>
// kernel: tpu_custom_call.1
= control target key start
LH: loop header
LB: loop body
LE: loop exit
PB: predicated region body
PF: predicated region fallthrough
CT: control target
= control target key end

     0   :  { %s3726_s0 = inlined_call_operand.vmem [shape: f32[4,8,32], index: 0, kind: input, shape index: {}]   ;;  %s3727_s1 = inlined_call_operand.vmem [shape: bf16[4,8,8], index: 1, kind: input, shape index: {}]   ;;  %s3728_s2 = inlined_call_operand.hbm [shape: bf16[4,8,8], index: 2, kind: input, shape index: {}]   ;;  %s3729_s3 = inlined_call_operand.hbm [shape: bf16[32,32], index: 3, kind: input, shape index: {}]   ;;  %s3730_s4 = inlined_call_operand.hbm [shape: bf16[32,96], index: 4, kind: input, shape index: {}]   ;;  %s3731_s5 = inlined_call_operand.hbm [shape: bf16[4,8,32], index: 5, kind: input, shape index: {}]   ;;  %s3732_s6 = inlined_call_operand.hbm [shape: bf16[32,64], index: 6, kind: input, shape index: {}]   ;;  %s3733_s7 = inlined_call_operand.vmem [shape: bf16[64,32], index: 7, kind: input, shape index: {}]   ;;  %s3734_s8 = inlined_call_operand.hbm [shape: f32[9,96], index: 8, kind: input, shape index: {}]   ;;  %s3735_s9 = inlined_call_operand.hbm [shape: f32[4,8,32], index: 9, kind: output, shape index: {}]  }
   0x1   :  { %3741 = sst [smem:[#allocation19_spill]] %s3729_s3 }
   0x2   :  { %3742 = sst [smem:[#allocation20_spill]] %s3735_s9 }
   0x3   :  { %14 = vsyncpa [#allocation3], 0 }
   0x4   :  { %16 = vsyncpa [#allocation3 + $0x1], 0 }
   0x5   :  { %17 = vsyncpa [#allocation6], 0 }
   0x6   :  { %18 = vsyncpa [#allocation9], 0 }
   0x7   :  { %19 = vsyncpa [#allocation12], 0 }
   0x8   :  { %20 = vsyncpa [#allocation4], 0 }
   0x9   :  { %22 = vsyncpa [#allocation4 + $0x1], 0  ;;  %s3128_s30 = smov 0   ;;  %s3130_s10 = smov 0  }
   0xa   :  { %s3132_s11 = smov 0   ;;  %s3134_s12 = smov 0  }
   0xb LB: > { %s3052_s13 = smov [#allocation5]   ;;  %s3149_s15 = sadd.s32 4294967295, %s3050_s12   ;;  %s3050_s12 = sphi %s3134_s12, %s3767_s12   ;;  %s3046_s11 = sphi %s3132_s11, %s3766_s11   ;;  %s3042_s10 = sphi %s3130_s10, %s3765_s10   ;;  %s3038_s30 = sphi %s3128_s30, %s3764_s30  }
   0xc   : > { %s275_s14 = sshll.u32 %s3052_s13, 4  ;;  %p2318_p0 = scmp.ge.s32.totalorder %s3050_s12, 1  ;;  %s3154_s14 = int_to_ptr.vmem [resolvable:$true] %s275_s14 }
   0xd   : > { %p3737_p1 = scmp.eq.s32.totalorder %s3149_s15, 0  ;;  %p263_p2 = scmp.lt.s32.totalorder %s3050_s12, 3 }
   0xe   : > { %s3053_s17 = smov [#allocation8]   ;;  %s3054_s20 = smov [#allocation7]  }
   0xf   : > { %p3156_p3 = pnand %p2318_p0, %p263_p2  ;;  %s301_s18 = sshll.u32 %s3053_s17, 4  ;;  %s3169_s18 = int_to_ptr.vmem [resolvable:$true] %s301_s18 }
  0x10   : > { %s288_s21 = sshll.u32 %s3054_s20, 4  ;;  %s3745_s3 = sld [smem:[#allocation19_spill]]  ;;  %s3171_s21 = int_to_ptr.vmem [resolvable:$true] %s288_s21 }
  0x11   : > { %s3743_s16 = scalar_select %p3156_p3, 1, 0 }
  0x12   : > { %p2652_p5 = pneg %p3156_p3 }
  0x14   : > { %p3165_p6 = pnand %p2652_p5, %p3737_p1 }
  0x16   : > { %s2802_s24 = scalar_lea.hbm %s3745_s3, 256  ;;  %p3181_p8 = pneg %p3165_p6 }
  0x17   : > { %p2803_p7 = scmp.ne.s32.totalorder %s3745_s3, %s2802_s24  ;;  %p2809_p11 = scmp.lt.u32.totalorder %s2802_s24, %s3745_s3 }
  0x19   : > { %p2805_p9 = pnand %p3181_p8, %p2803_p7 }
  0x1b   : > { %p2806_p10 = pneg %p2805_p9 }
  0x1d   : > { %p2811_p12 = pnand %p2809_p11, %p2806_p10 }
  0x1f   : > { %2814 = shalt.err (!%p2811_p12)
}
  0x20   : > { %s2815_s13 = scalar_lea.vmem %s3154_s14, 256  ;;  %p2823_p5 = scmp.lt.s32.totalorder %s3154_s14, %s3154_s14 }
  0x21   : > { %p2816_p13 = scmp.ne.s32.totalorder %s3154_s14, %s2815_s13  ;;  %p2824_p4 = scmp.lt.s32.totalorder %s2815_s13, %s2815_s13 }
  0x23   : > { %p2818_p0 = pnand %p2816_p13, %p3181_p8  ;;  %p2825_p7 = por %p2824_p4, %p2823_p5 }
  0x25   : > { %p2819_p2 = pneg %p2818_p0 }
  0x27   : > { %p2826_p9 = pnand %p2825_p7, %p2819_p2 }
  0x29   : > { %2829 = shalt.err (!%p2826_p9)
}
  0x2a   : > { %s3739_s17 = smov 64   ;;  %s3056_s20 = smov 4  }
  0x2b   : > { %2655 = dma.hbm_to_vmem [thread:$0]  (!%p3165_p6), %s3745_s3, 256, %s3154_s14, [#allocation6], %s3739_s17, %s3739_s17, %s3056_s20  }
  0x2c   : > { %s2830_s26 = scalar_lea.hbm %s3731_s5, 256 }
  0x2d   : > { %p2831_p4 = scmp.ne.s32.totalorder %s3731_s5, %s2830_s26  ;;  %p2837_p12 = scmp.lt.u32.totalorder %s2830_s26, %s3731_s5 }
  0x2f   : > { %p2833_p10 = pnand %p2831_p4, %p3181_p8 }
  0x31   : > { %p2834_p11 = pneg %p2833_p10 }
  0x33   : > { %p2839_p13 = pnand %p2837_p12, %p2834_p11 }
  0x35   : > { %2842 = shalt.err (!%p2839_p13)
}
  0x36   : > { %s2843_s14 = scalar_lea.vmem %s3169_s18, 256  ;;  %p2851_p7 = scmp.lt.s32.totalorder %s3169_s18, %s3169_s18 }
  0x37   : > { %p2844_p0 = scmp.ne.s32.totalorder %s3169_s18, %s2843_s14  ;;  %p2852_p9 = scmp.lt.s32.totalorder %s2843_s14, %s2843_s14 }
  0x39   : > { %p2846_p2 = pnand %p2844_p0, %p3181_p8  ;;  %p2853_p4 = por %p2852_p9, %p2851_p7 }
  0x3b   : > { %p2847_p5 = pneg %p2846_p2 }
  0x3d   : > { %p2854_p10 = pnand %p2853_p4, %p2847_p5 }
  0x3f   : > { %2857 = shalt.err (!%p2854_p10)
}
  0x40   : > { %2661 = dma.hbm_to_vmem [thread:$0]  (!%p3165_p6), %s3731_s5, 256, %s3169_s18, [#allocation9], %s3739_s17, %s3739_s17, %s3056_s20  }
  0x41   : > { %s2858_s25 = scalar_lea.hbm %s3730_s4, 256 }
  0x42   : > { %p2859_p11 = scmp.ne.s32.totalorder %s3730_s4, %s2858_s25  ;;  %p2865_p0 = scmp.lt.u32.totalorder %s2858_s25, %s3730_s4 }
  0x44   : > { %p2861_p12 = pnand %p2859_p11, %p3181_p8 }
  0x46   : > { %p2862_p13 = pneg %p2861_p12 }
  0x48   : > { %p2867_p2 = pnand %p2865_p0, %p2862_p13 }
  0x4a   : > { %2870 = shalt.err (!%p2867_p2)
}
  0x4b   : > { %s2871_s18 = scalar_lea.vmem %s3171_s21, 256  ;;  %p2879_p4 = scmp.lt.s32.totalorder %s3171_s21, %s3171_s21 }
  0x4c   : > { %p2872_p5 = scmp.ne.s32.totalorder %s3171_s21, %s2871_s18  ;;  %p2880_p10 = scmp.lt.s32.totalorder %s2871_s18, %s2871_s18 }
  0x4e   : > { %p2874_p7 = pnand %p2872_p5, %p3181_p8  ;;  %p2881_p11 = por %p2880_p10, %p2879_p4 }
  0x50   : > { %p2875_p9 = pneg %p2874_p7 }
  0x52   : > { %p2882_p12 = pnand %p2881_p11, %p2875_p9 }
  0x54   : > { %2885 = shalt.err (!%p2882_p12)
}
  0x55   : > { %2658 = dma.hbm_to_vmem [thread:$0]  (!%p3165_p6), %s3730_s4, 256, %s3171_s21, [#allocation6], %s3739_s17, %s3739_s17, %s3056_s20  }
  0x56   : > { %s3057_s22 = smov [#allocation10]   ;;  %s3058_s24 = smov [#allocation11]  }
  0x57   : > { %s314_s23 = sshll.u32 %s3057_s22, 4  ;;  %s330_s25 = sshll.u32 %s3058_s24, 4  ;;  %s315_s23 = int_to_ptr.vmem [resolvable:$true] %s314_s23  ;;  %s331_s25 = int_to_ptr.vmem [resolvable:$true] %s330_s25 }
  0x58   : > { %s2886_s29 = scalar_lea.hbm %s3732_s6, 256 }
  0x59   : > { %p2887_p13 = scmp.ne.s32.totalorder %s3732_s6, %s2886_s29  ;;  %p2893_p5 = scmp.lt.u32.totalorder %s2886_s29, %s3732_s6 }
  0x5b   : > { %p2889_p0 = pnand %p2887_p13, %p3181_p8 }
  0x5d   : > { %p2890_p2 = pneg %p2889_p0 }
  0x5f   : > { %p2895_p7 = pnand %p2893_p5, %p2890_p2 }
  0x61   : > { %2898 = shalt.err (!%p2895_p7)
}
  0x62   : > { %s2899_s21 = scalar_lea.vmem %s315_s23, 256  ;;  %p2907_p11 = scmp.lt.s32.totalorder %s315_s23, %s315_s23 }
  0x63   : > { %p2900_p9 = scmp.ne.s32.totalorder %s315_s23, %s2899_s21  ;;  %p2908_p12 = scmp.lt.s32.totalorder %s2899_s21, %s2899_s21 }
  0x65   : > { %p2902_p4 = pnand %p2900_p9, %p3181_p8  ;;  %p2909_p1 = por %p2908_p12, %p2907_p11 }
  0x67   : > { %p2903_p10 = pneg %p2902_p4 }
  0x69   : > { %p2910_p3 = pnand %p2909_p1, %p2903_p10 }
  0x6b   : > { %2913 = shalt.err (!%p2910_p3)
}
  0x6c   : > { %2664 = dma.hbm_to_vmem [thread:$0]  (!%p3165_p6), %s3732_s6, 256, %s315_s23, [#allocation9], %s3739_s17, %s3739_s17, %s3056_s20  }
  0x6d   : > { %s2914_s26 = scalar_lea.hbm %s3734_s8, 256 }
  0x6e   : > { %p2915_p1 = scmp.ne.s32.totalorder %s3734_s8, %s2914_s26  ;;  %p2921_p0 = scmp.lt.u32.totalorder %s2914_s26, %s3734_s8 }
  0x70   : > { %p2917_p3 = pnand %p2915_p1, %p3181_p8 }
  0x72   : > { %p2918_p13 = pneg %p2917_p3 }
  0x74   : > { %p2923_p2 = pnand %p2921_p0, %p2918_p13 }
  0x76   : > { %2926 = shalt.err (!%p2923_p2)
}
  0x77   : > { %s2927_s14 = scalar_lea.vmem %s331_s25, 256  ;;  %p2935_p4 = scmp.lt.s32.totalorder %s331_s25, %s331_s25 }
  0x78   : > { %p2928_p5 = scmp.ne.s32.totalorder %s331_s25, %s2927_s14  ;;  %p2936_p10 = scmp.lt.s32.totalorder %s2927_s14, %s2927_s14 }
  0x7a   : > { %p2930_p7 = pnand %p2928_p5, %p3181_p8  ;;  %p2937_p11 = por %p2936_p10, %p2935_p4 }
  0x7c   : > { %p2931_p9 = pneg %p2930_p7 }
  0x7e   : > { %p2938_p12 = pnand %p2937_p11, %p2931_p9 }
  0x80   : > { %2941 = shalt.err (!%p2938_p12)
}
  0x81   : > { %s3059_s23 = smov 128   ;;  %s3060_s27 = smov 8  }
  0x82   : > { %2667 = dma.hbm_to_vmem [thread:$0]  (!%p3165_p6), %s3734_s8, 256, %s331_s25, [#allocation12], %s3059_s23, %s3059_s23, %s3060_s27  }
  0x83   : > { %s2317_s9 = sadd.s32 4294967294, %s3050_s12   ;;  %s3298_s22 = sadd.s32 1, %s3050_s12  }
  0x84   : > { %s87_s24 = sadd.s32 1, %s3046_s11  ;;  %s84_s26 = ssub.s32 %s3050_s12, %s3298_s22 }
  0x85   : > { %p94_p8 = scmp.ne.s32.totalorder %s3046_s11, %s3042_s10  ;;  %p85_p1 = scmp.eq.s32.totalorder %s84_s26, 0 }
  0x86   : > { %p95_p3 = scmp.eq.s32.totalorder %s3050_s12, 0  ;;  %p100_p13 = scmp.ne.s32.totalorder %s3042_s10, %s3038_s30 }
  0x87   : > { %p250_p0 = scmp.eq.s32.totalorder %s3149_s15, 1  ;;  %p3747_p5 = scmp.eq.s32.totalorder %s3149_s15, 0 }
  0x88   : > { %s3310_s28 = scalar_select %p85_p1, %s3046_s11, %s87_s24  }
  0x89   : > { %p96_p2 = por %p95_p3, %p94_p8  ;;  %p3314_p7 = por %p3747_p5, %p100_p13 }
  0x8a   : > { %p3318_p6 = por %p250_p0, %p94_p8  ;;  %p256_p9 = scmp.eq.s32.totalorder %s2317_s9, 1 }
  0x8b   : > { %p2681_p4 = scmp.lt.s32.totalorder %s3050_s12, 2  ;;  %s362_s29 = sand.u32 1, %s3046_s11  }
  0x8c   : > { %s3749_s25 = scalar_select %p3318_p6, 1, 0 }
  0x8d   : > { %p3324_p10 = por %p256_p9, %p100_p13  ;;  %s2325_s18 = sshll.u32 %s362_s29, 3 }
  0x8e   : > { %s2384_s14 = sshll.u32 %s3050_s12, 7  ;;  %s366_s3 = scalar_lea.vmem [#allocation2], %s2325_s18 }
  0x8f   : > { %s3750_s13 = scalar_select %p3324_p10, 1, 0 }
  0x90   : > { %s3332_s21 = scalar_lea.hbm %s3728_s2, %s2384_s14  ;;  %s373_s24 = sshll.u32 %s366_s3, 4  ;;  %s3338_s24 = int_to_ptr.vmem [resolvable:$true] %s373_s24 }
  0x91   : > { %p3334_p11 = pnand %p2681_p4, %p96_p2  ;;  %s3340_s26 = scalar_lea.sflag [#allocation3], %s362_s29 }
  0x92   : > { %s2942_s17 = scalar_lea.hbm %s3332_s21, 128  ;;  %s2947_s23 = scalar_lea.hbm %s3728_s2, 256 }
  0x93   : > { %p2943_p12 = scmp.ne.s32.totalorder %s3332_s21, %s2942_s17  ;;  %p2944_p8 = pneg %p3334_p11 }
  0x94   : > { %p2948_p13 = scmp.lt.u32.totalorder %s3332_s21, %s3728_s2  ;;  %p2949_p0 = scmp.lt.u32.totalorder %s2947_s23, %s2942_s17 }
  0x95   : > { %p2945_p1 = pnand %p2944_p8, %p2943_p12  ;;  %p2951_p5 = scmp.lt.u32.totalorder %s2942_s17, %s3332_s21 }
  0x96   : > { %p2950_p2 = por %p2949_p0, %p2948_p13 }
  0x97   : > { %p2946_p3 = pneg %p2945_p1 }
  0x98   : > { %p2952_p9 = por %p2951_p5, %p2950_p2 }
  0x9a   : > { %p2953_p4 = pnand %p2952_p9, %p2946_p3 }
  0x9c   : > { %2956 = shalt.err (!%p2953_p4)
}
  0x9d   : > { %s2957_s29 = scalar_lea.vmem %s3338_s24, 128  ;;  %s3061_s18 = smov [#allocation2]  }
  0x9e   : > { %p2958_p12 = scmp.ne.s32.totalorder %s3338_s24, %s2957_s29  ;;  %s2962_s14 = sshll.u32 %s3061_s18, 4  ;;  %s2963_s14 = int_to_ptr.vmem [resolvable:$false] %s2962_s14 }
  0x9f   : > { %s2964_s27 = scalar_lea.vmem %s2963_s14, 256  ;;  %p2965_p6 = scmp.lt.s32.totalorder %s3338_s24, %s2963_s14 }
  0xa0   : > { %p2960_p1 = pnand %p2958_p12, %p2944_p8  ;;  %p2966_p13 = scmp.lt.s32.totalorder %s2964_s27, %s2957_s29 }
  0xa2   : > { %p2961_p10 = pneg %p2960_p1  ;;  %p2967_p0 = por %p2966_p13, %p2965_p6 }
  0xa4   : > { %p2968_p2 = pnand %p2967_p0, %p2961_p10 }
  0xa6   : > { %2971 = shalt.err (!%p2968_p2)
}
  0xa7   : > { %s3752_s17 = smov 64   ;;  %p3753_p8 = scmp.ne.s32.totalorder %s3743_s16, 0 }
  0xa8   : > { %2671 = dma.hbm_to_vmem [thread:$0]  (!%p3334_p11), %s3332_s21, 128, %s3338_s24, %s3340_s26, %s3752_s17, %s3752_s17, %s3056_s20  }
  0xa9   : > { %385 = sbr.rel (%p3753_p8) target bundleno = 5441 (0x1541), region = 56  ;;  %s3374_s23 = sand.u32 (!%p3753_p8), 1, %s3042_s10  }
  0xaa   : > { %s2329_s3 = sshll.u32 (!%p3753_p8), %s3374_s23, 3  ;;  %s388_s29 = scalar_lea.sflag (!%p3753_p8), [#allocation3], %s3374_s23 }
  0xab   : > { %s391_s18 = scalar_lea.vmem (!%p3753_p8), [#allocation2], %s2329_s3 }
  0xb0   : > { %3017 = dma.done.wait (%p3314_p7), %s388_s29, 128  }
  0xb1   : > { %3019 = vsyncadd (%p3314_p7), %s388_s29, 4294967168  ;;  %p3754_p6 = scmp.eq.s32.totalorder %s3149_s15, 0 }
  0xb3   : > { %3021 = dma.done.wait (%p3754_p6), [#allocation6], 512   ;;  %p3755_p10 = pmov %p3754_p6 }
  0xb4   : > { %p3756_p11 = pmov %p3754_p6 }
  0xb5   : > { %3023 = vsyncadd (%p3755_p10), [#allocation6], 4294966784 }
  0xb6   : > { %3025 = dma.done.wait (%p3756_p11), [#allocation9], 512   ;;  %p3757_p3 = pmov %p3754_p6 }
  0xb8   : > { %3027 = vsyncadd (%p3757_p3), [#allocation9], 4294966784  ;;  %p3758_p5 = pmov %p3757_p3 }
  0xb9   : > { %p3759_p9 = pmov %p3757_p3 }
  0xba   : > { %3029 = dma.done.wait (%p3758_p5), [#allocation12], 256  }
  0xbb   : > { %3031 = vsyncadd (%p3759_p9), [#allocation12], 4294967040  ;;  %s2336_s16 = sshll.u32 %s3149_s15, 1  ;;  %vm505_vm0 = vcmask 64512   ;;  %v3062_v6 = vmov 0.0   ;;  %vm3063_vm1 = vmmov 0  }
  0xbc   : > { %p457_p7 = scmp.lt.s32.totalorder %s2336_s16, 3  ;;  %2448 = vmatprep.subr.bf16.mxu0 %v3062_v6  ;;  %2454 = vmatprep.subr.bf16.mxu1 %v3062_v6  ;;  %v475_v7 = vld [vmem:[%s391_s18] sm:$0xf]  ;;  %v476_v8 = vld [vmem:[%s391_s18 + $0x4] sm:$0xf]  ;;  %vm545_vm3 = vcmask 1043456  }
  0xbd   : > { %2450 = vmatprep.mubr.msk.bf16.mxu0 %vm3063_vm1, %v3062_v6  ;;  %2456 = vmatprep.mubr.msk.bf16.mxu1 %vm3063_vm1, %v3062_v6  ;;  %v512_v9 = vunpack.c.l.bf16 %v475_v7  ;;  %v513_v10 = vunpack.c.l.bf16 %v476_v8  ;;  %v2744_v51 = vld [vmem:[#allocation5] sm:$0xff]   ;;  %v2745_v52 = vld [vmem:[#allocation5 + $0x8] sm:$0xff]   ;;  %vm750_vm7 = vcmask 261120   ;;  %s3064_s17 = smov 96   ;;  %s3065_s3 = smov 64   ;;  %vm2071_vm8 = vcmask 523264  }
  0xbe   : > { %s3769_s16 = smov (!%p457_p7, %s2336_s16), 3  ;;  %s3066_s29 = smov 88  }
  0xbf   : > { %s2339_s20 = sshll.u32 %s3769_s16, 2  ;;  %v514_v11 = vsel %vm505_vm0, %v512_v9, 0.0  ;;  %v517_v12 = vsel %vm505_vm0, %v513_v10, 0.0  ;;  %s2337_s9 = sshll.u32 %s3769_s16, 3 }
  0xc0   : > { %s466_s24 = scalar_lea.vmem %s3727_s1, %s2339_s20  ;;  %515 = vadd.xlane.f32.xlu1 %v514_v11  ;;  %s460_s27 = scalar_lea.vmem %s3726_s0, %s2337_s9 }
  0xc1   : > { %v3401_v0 = vld [vmem:[%s466_s24] sm:$0xf]  ;;  %v3403_v1 = vld [vmem:[%s466_s24 + $0x4] sm:$0xf]  ;;  %v3427_v21 = vld [vmem:[%s460_s27 + $0x8] sm:$0xff]  ;;  %s3067_s18 = smov 120  }
  0xc2   : > { %v503_v2 = vunpack.c.l.bf16 %v3401_v0  ;;  %v504_v3 = vunpack.c.l.bf16 %v3403_v1  ;;  %v3421_v17 = vld [vmem:[%s460_s27] sm:$0xff]  ;;  %s3068_s16 = smov 56   ;;  %s3069_s20 = smov 80  }
  0xc3   : > { %s3070_s19 = smov 112   ;;  %s3071_s21 = smov 48  }
  0xc4   : > { %v506_v4 = vsel %vm505_vm0, %v503_v2, 0.0  ;;  %v509_v5 = vsel %vm505_vm0, %v504_v3, 0.0  ;;  %518 = vadd.xlane.f32.xlu1 %v517_v12  ;;  %v734_v2 = vlaneseq  ;;  %s3072_s24 = smov 72   ;;  %s3073_s9 = smov 104  }
  0xc5   : > { %507 = vadd.xlane.f32.xlu0 %v506_v4  ;;  %s3074_s26 = smov 40   ;;  %s3760_s27 = sld [smem:[#allocation20_spill]] }
  0xc6   : > { %v3460_v3 = vshrl.u32 %v734_v2, 7  ;;  %p3761_p12 = scmp.ne.s32.totalorder %s3749_s25, 0 }
  0xc8   : > { %v736_v4 = vsub.s32 0, %v3460_v3 }
  0xc9   : > { %510 = vadd.xlane.f32.xlu0 %v509_v5  ;;  %v3463_v5 = vld [vmem:[#allocation11] sm:$0xff] }
 0x14d   : > { %v516_v29 = vpop.xlane.xlu1 %515 }
 0x14e   : > { %v530_v30 = vadd.f32 1e-06, %v516_v29  ;;  %vm528_vm5 = vcmp.gt.f32.partialorder %v516_v29, 0.0 }
 0x151   : > { %v519_v31 = vpop.xlane.xlu1 %518 }
 0x152   : > { %v508_v13 = vpop.xlane.xlu0 %507  ;;  %v531_v32 = vadd.f32 1e-06, %v519_v31  ;;  %vm529_vm6 = vcmp.gt.f32.partialorder %v519_v31, 0.0 }
 0x153   : > { %v522_v14 = vadd.f32 1e-12, %v508_v13  ;;  %vm520_vm2 = vcmp.gt.f32.partialorder %v508_v13, 0.0 }
 0x155   : > { %2754 = vrsqrt.f32 %v522_v14 }
 0x156   : > { %v511_v15 = vpop.xlane.xlu0 %510 }
 0x157   : > { %v523_v16 = vadd.f32 1e-12, %v511_v15  ;;  %vm521_vm4 = vcmp.gt.f32.partialorder %v511_v15, 0.0  ;;  %v798_v15 = vsub.s32 1, %v3460_v3 }
 0x159   : > { %2756 = vrsqrt.f32 %v523_v16  ;;  %v799_v16 = vrot.slane %v3463_v5, %v798_v15 }
 0x15a   : > { %2758 = vrcp.f32 %v530_v30 }
 0x15b   : > { %2760 = vrcp.f32 %v531_v32 }
 0x15f   : > { %v2755_v18 = vpop.eup %2754 }
 0x160   : > { %v3423_v19 = vsel %vm520_vm2, %v2755_v18, 0.0 }
 0x161   : > { %v538_v20 = vmul.f32 %v3423_v19, %v3421_v17 }
 0x163   : > { %v2757_v22 = vpop.eup %2756  ;;  %v540_v23 = vpack.c.bf16 %v538_v20, %v538_v20 }
 0x164   : > { %v527_v24 = vsel %vm521_vm4, %v2757_v22, 0.0  ;;  %v2759_v33 = vpop.eup %2758 }
 0x165   : > { %v547_v25 = vsel %vm545_vm3, %v540_v23, 0  ;;  %v539_v26 = vmul.f32 %v527_v24, %v3427_v21  ;;  %v536_v34 = vsel %vm528_vm5, %v2759_v33, 0.0  ;;  %v2761_v36 = vpop.eup %2760 }
 0x166   : > { %2449 = vmatpush3.bf16.msra.mxu0 %v547_v25  ;;  %v537_v42 = vsel %vm529_vm6, %v2761_v36, 0.0 }
 0x167   : > { %v541_v27 = vpack.c.bf16 %v539_v26, %v539_v26  ;;  %2460 = vmatprep.subr.bf16.mxu0 %v3062_v6 }
 0x169   : > { %2451 = vmatmul.mubr.msk.bf16.vlgmr.msra.gmra.mrb[0].mxu0 %vm505_vm0, %v475_v7  ;;  %v593_v28 = vsel %vm545_vm3, %v541_v27, 0  ;;  %v737_v7 = vrot.slane %v3463_v5, %v736_v4 }
 0x16a   : > { %2455 = vmatpush3.bf16.msra.mxu1 %v593_v28  ;;  %2462 = vmatprep.mubr.msk.bf16.mxu0 %vm3063_vm1, %v3062_v6 }
 0x16b   : > { %2466 = vmatprep.subr.bf16.mxu1 %v3062_v6 }
 0x16d   : > { %2457 = vmatmul.mubr.msk.bf16.vlgmr.msra.gmra.mrb[0].mxu1 %vm505_vm0, %v476_v8 }
 0x16e   : > { %2468 = vmatprep.mubr.msk.bf16.mxu1 %vm3063_vm1, %v3062_v6 }
 0x23c   : > { %v583_v35 = vpop.f32.mrb[0].mxu0 }
 0x23d   : > { %v635_v37 = vmul.f32 %v583_v35, %v536_v34  ;;  %v2452_v38 = vpop.f32.mrb[1].mxu0 }
 0x23e   : > { %v586_v39 = vpop.f32.mrb[2].mxu0 }
 0x23f   : > { %v637_v40 = vpack.c.bf16 %v635_v37, %v635_v37  ;;  %v2453_v41 = vpop.f32.mrb[3].mxu0 }
 0x240   : > { %v629_v43 = vpop.f32.mrb[0].mxu1 }
 0x241   : > { %v643_v44 = vsel %vm545_vm3, %v637_v40, 0  ;;  %v636_v45 = vmul.f32 %v629_v43, %v537_v42  ;;  %v2458_v46 = vpop.f32.mrb[1].mxu1 }
 0x242   : > { %v632_v47 = vpop.f32.mrb[2].mxu1  ;;  %2461 = vmatpush3.bf16.msra.mxu0 %v643_v44 }
 0x243   : > { %v638_v48 = vpack.c.bf16 %v636_v45, %v636_v45  ;;  %v2459_v49 = vpop.f32.mrb[3].mxu1  ;;  %2472 = vmatprep.subr.bf16.mxu0 %v3062_v6 }
 0x245   : > { %v689_v50 = vsel %vm545_vm3, %v638_v48, 0  ;;  %2463 = vmatmul.mubr.msk.bf16.vlgmr.msra.gmra.mrb[4].mxu0 %vm505_vm0, %v3401_v0  ;;  %v2746_v0 = vld [vmem:[#allocation7] sm:$0xff]  }
 0x246   : > { %2467 = vmatpush3.bf16.msra.mxu1 %v689_v50  ;;  %2476 = vmatprep.mubr.msk.bf16.mxu0 %vm3063_vm1, %v3062_v6 }
 0x247   : > { %2480 = vmatprep.subr.bf16.mxu1 %v3062_v6  ;;  %2473 = vmatpush3.bf16.msra.mxu0 %v2744_v51 }
 0x248   : > { %2474 = vmatprep.subr.bf16.mxu0 %v3062_v6 }
 0x249   : > { %2469 = vmatmul.mubr.msk.bf16.vlgmr.msra.gmra.mrb[4].mxu1 %vm505_vm0, %v3403_v1  ;;  %v2747_v1 = vld [vmem:[#allocation7 + $0x8] sm:$0xff]  }
 0x24a   : > { %2484 = vmatprep.mubr.msk.bf16.mxu1 %vm3063_vm1, %v3062_v6  ;;  %2481 = vmatpush3.bf16.msra.mxu1 %v2746_v0 }
 0x24b   : > { %2475 = vmatpush3.bf16.msra.mxu0 %v2745_v52  ;;  %2482 = vmatprep.subr.bf16.mxu1 %v3062_v6 }
 0x24c   : > { %2488 = vmatprep.subr.bf16.mxu0 %v3062_v6 }
 0x24e   : > { %2483 = vmatpush3.bf16.msra.mxu1 %v2747_v1 }
 0x24f   : > { %2494 = vmatprep.subr.bf16.mxu1 %v3062_v6 }
 0x318   : > { %v679_v53 = vpop.f32.mrb[4].mxu0 }
 0x319   : > { %v2464_v54 = vpop.f32.mrb[5].mxu0  ;;  %v731_v58 = vmul.f32 %v679_v53, %v3423_v19 }
 0x31a   : > { %v682_v55 = vpop.f32.mrb[6].mxu0 }
 0x31b   : > { %v2465_v56 = vpop.f32.mrb[7].mxu0 }
 0x31c   : > { %v725_v57 = vpop.f32.mrb[4].mxu1 }
 0x31d   : > { %v732_v59 = vmul.f32 %v725_v57, %v527_v24  ;;  %v2470_v60 = vpop.f32.mrb[5].mxu1 }
 0x31e   : > { %v728_v61 = vpop.f32.mrb[6].mxu1 }
 0x31f   : > { %v733_v62 = vpack.c.bf16 %v732_v59, %v731_v58  ;;  %v2471_v63 = vpop.f32.mrb[7].mxu1 }
 0x321   : > { %2477 = vmatmul.mubr.msk.bf16.vlgmr.msra.gmra.mrb[8].mxu0 %vm750_vm7, %v733_v62 }
 0x322   : > { %2490 = vmatprep.mubr.msk.bf16.mxu0 %vm3063_vm1, %v3062_v6 }
 0x3f4   : > { %v788_v8 = vpop.f32.mrb[8].mxu0 }
 0x3f5   : > { %v2478_v9 = vpop.f32.mrb[9].mxu0  ;;  %v789_v11 = vadd.f32 %v788_v8, %v737_v7 }
 0x3f6   : > { %v791_v10 = vpop.f32.mrb[10].mxu0 }
 0x3f7   : > { %v792_v12 = vadd.f32 %v791_v10, %v737_v7  ;;  %v2479_v13 = vpop.f32.mrb[11].mxu0 }
 0x3f9   : > { %v795_v14 = vpack.c.bf16 %v792_v12, %v789_v11 }
 0x3fb   : > { %2485 = vmatmul.mubr.msk.bf16.vlgmr.msra.gmra.mrb[8].mxu1 %vm750_vm7, %v795_v14 }
 0x3fc   : > { %2496 = vmatprep.mubr.msk.bf16.mxu1 %vm3063_vm1, %v3062_v6 }
 0x4ce   : > { %v849_v18 = vpop.f32.mrb[8].mxu1 }
 0x4cf   : > { %v850_v19 = vadd.f32 %v849_v18, %v799_v16  ;;  %v2486_v20 = vpop.f32.mrb[9].mxu1 }
 0x4d0   : > { %v852_v22 = vpop.f32.mrb[10].mxu1 }
 0x4d1   : > { %v3471_v23 = vpack.c.bf16 %v850_v19, %v850_v19  ;;  %v853_v24 = vadd.f32 %v852_v22, %v799_v16  ;;  %v2487_v25 = vpop.f32.mrb[11].mxu1 }
 0x4d3   : > { %v3473_v26 = vpack.c.bf16 %v853_v24, %v853_v24  ;;  %859 = vrot.lane.b32.xlu0 %v3471_v23, %s3064_s17 }
 0x4d5   : > { %908 = vrot.lane.b32.xlu1 %v3473_v26, %s3064_s17 }
 0x545   : > { %v860_v27 = vpop.permute.xlu0 %859 }
 0x546   : > { %v865_v28 = vsel %vm505_vm0, %v860_v27, 0 }
 0x547   : > { %2489 = vmatpush3.bf16.xpose.msra.mxu0 %v865_v28  ;;  %v909_v29 = vpop.permute.xlu1 %908 }
 0x548   : > { %v914_v30 = vsel %vm505_vm0, %v909_v29, 0  ;;  %2500 = vmatprep.subr.bf16.mxu0 %v3062_v6 }
 0x549   : > { %2495 = vmatpush3.bf16.xpose.msra.mxu1 %v914_v30 }
 0x54a   : > { %2506 = vmatprep.subr.bf16.mxu1 %v3062_v6 }
 0x54e   : > { %2491 = vmatmul.mubr.msk.bf16.vlgmr.msra.gmra.mrb[12].mxu0 %vm505_vm0, %v3471_v23 }
 0x54f   : > { %2502 = vmatprep.mubr.msk.bf16.mxu0 %vm3063_vm1, %v3062_v6 }
 0x550   : > { %2497 = vmatmul.mubr.msk.bf16.vlgmr.msra.gmra.mrb[12].mxu1 %vm505_vm0, %v3473_v26 }
 0x551   : > { %2508 = vmatprep.mubr.msk.bf16.mxu1 %vm3063_vm1, %v3062_v6 }
 0x621   : > { %v901_v31 = vpop.f32.mrb[12].mxu0 }
 0x622   : > { %v2492_v32 = vpop.f32.mrb[13].mxu0  ;;  %v956_v33 = vsel %vm505_vm0, %v901_v31, -inf }
 0x623   : > { %v950_v34 = vpop.f32.mrb[12].mxu1  ;;  %957 = vmax.xlane.f32.xlu1 %v956_v33  ;;  %v904_v35 = vpop.f32.mrb[14].mxu0 }
 0x624   : > { %v2493_v36 = vpop.f32.mrb[15].mxu0  ;;  %v2498_v37 = vpop.f32.mrb[13].mxu1  ;;  %v959_v38 = vsel %vm505_vm0, %v950_v34, -inf }
 0x625   : > { %960 = vmax.xlane.f32.xlu0 %v959_v38  ;;  %v953_v39 = vpop.f32.mrb[14].mxu1 }
 0x626   : > { %v2499_v40 = vpop.f32.mrb[15].mxu1 }
 0x634   : > { %1028 = vrot.lane.b32.xlu1 %v3473_v26, %s3065_s3 }
 0x638   : > { %1079 = vrot.lane.b32.xlu1 %v3471_v23, %s3066_s29 }
 0x6b0   : > { %v958_v41 = vpop.xlane.xlu1 %957 }
 0x6b1   : > { %v962_v42 = vsub.f32 %v901_v31, %v958_v41 }
 0x6b2   : > { %v961_v43 = vpop.xlane.xlu0 %960 }
 0x6b3   : > { %v964_v44 = vmul.f32 1.442695, %v962_v42  ;;  %v963_v45 = vsub.f32 %v950_v34, %v961_v43 }
 0x6b4   : > { %v1029_v46 = vpop.permute.xlu1 %1028 }
 0x6b5   : > { %2762 = vpow2.f32 %v964_v44  ;;  %v966_v47 = vmul.f32 1.442695, %v963_v45  ;;  %v1034_v48 = vsel %vm545_vm3, %v1029_v46, 0 }
 0x6b6   : > { %2507 = vmatpush3.bf16.msra.mxu1 %v1034_v48  ;;  %v486_v48 = vld [vmem:[#allocation8 + $0x4] sm:$0xf] }
 0x6b7   : > { %2764 = vpow2.f32 %v966_v47  ;;  %2518 = vmatprep.subr.bf16.mxu1 %v3062_v6 }
 0x6b8   : > { %v1080_v53 = vpop.permute.xlu1 %1079 }
 0x6b9   : > { %v1085_v0 = vsel %vm505_vm0, %v1080_v53, 0  ;;  %v485_v53 = vld [vmem:[#allocation8] sm:$0xf] }
 0x6bf   : > { %v2763_v49 = vpop.eup %2762 }
 0x6c0   : > { %v968_v50 = vsel %vm505_vm0, %v2763_v49, 0.0 }
 0x6c1   : > { %v2765_v51 = vpop.eup %2764  ;;  %969 = vadd.xlane.f32.xlu0 %v968_v50 }
 0x6c2   : > { %v971_v52 = vsel %vm505_vm0, %v2765_v51, 0.0 }
 0x6c3   : > { %972 = vadd.xlane.f32.xlu1 %v971_v52 }
 0x6d4   : > { %1129 = vrot.lane.b32.xlu1 %v3473_v26, %s3066_s29  ;;  %s3075_s29 = smov [#allocation13]  }
 0x6d7   : > { %980 = vrot.lane.b32.xlu0 %v3471_v23, %s3065_s3 }
 0x6d8   : > { %1127 = vrot.lane.b32.xlu1 %v3473_v26, %s3067_s18 }
 0x6db   : > { %1077 = vrot.lane.b32.xlu0 %v3471_v23, %s3067_s18  ;;  %s2976_s18 = sshll.u32 %s3075_s29, 4  ;;  %s2977_s18 = int_to_ptr.vmem [resolvable:$false] %s2976_s18 }
 0x74e   : > { %v970_v54 = vpop.xlane.xlu0 %969 }
 0x74f   : > { %2766 = vrcp.f32 %v970_v54 }
 0x750   : > { %v973_v55 = vpop.xlane.xlu1 %972 }
 0x751   : > { %2768 = vrcp.f32 %v973_v55 }
 0x752   : > { %v981_v56 = vpop.permute.xlu0 %980 }
 0x753   : > { %v986_v57 = vsel %vm545_vm3, %v981_v56, 0  ;;  %v1349_v56 = vsel %vm545_vm3, %v485_v53, 0 }
 0x754   : > { %2501 = vmatpush3.bf16.msra.mxu0 %v986_v57  ;;  %v1130_v63 = vpop.permute.xlu1 %1129 }
 0x755   : > { %2512 = vmatprep.subr.bf16.mxu0 %v3062_v6  ;;  %v1135_v2 = vsel %vm505_vm0, %v1130_v63, 0 }
 0x756   : > { %v1078_v4 = vpop.permute.xlu0 %1077 }
 0x758   : > { %v1128_v7 = vpop.permute.xlu1 %1127 }
 0x759   : > { %v2767_v58 = vpop.eup %2766 }
 0x75a   : > { %v975_v59 = vmul.f32 %v2767_v58, %v2763_v49 }
 0x75b   : > { %v2769_v60 = vpop.eup %2768 }
 0x75c   : > { %v977_v61 = vmul.f32 %v2769_v60, %v2765_v51  ;;  %v978_v62 = vpack.c.bf16 %v975_v59, %v975_v59  ;;  %v1302_v51 = vsel %vm545_vm3, %v486_v48, 0 }
 0x75e   : > { %2503 = vmatmul.mubr.msk.bf16.vlgmr.msra.gmra.mrb[16].mxu0 %vm505_vm0, %v978_v62  ;;  %v979_v1 = vpack.c.bf16 %v977_v61, %v977_v61 }
 0x75f   : > { %2513 = vmatpush3.bf16.xpose.msra.mxu0 %v1085_v0  ;;  %2514 = vmatprep.mubr.msk.bf16.mxu0 %vm3063_vm1, %v3062_v6 }
 0x760   : > { %2509 = vmatmul.mubr.msk.bf16.vlgmr.msra.gmra.mrb[16].mxu1 %vm505_vm0, %v979_v1  ;;  %2524 = vmatprep.subr.bf16.mxu0 %v3062_v6 }
 0x761   : > { %2519 = vmatpush3.bf16.xpose.msra.mxu1 %v1135_v2  ;;  %2520 = vmatprep.mubr.msk.bf16.mxu1 %vm3063_vm1, %v3062_v6 }
 0x762   : > { %2530 = vmatprep.subr.bf16.mxu1 %v3062_v6 }
 0x766   : > { %2515 = vmatmul.mubr.msk.bf16.vlgmr.msra.gmra.mrb[20].mxu0 %vm505_vm0, %v1078_v4 }
 0x767   : > { %2526 = vmatprep.mubr.msk.bf16.mxu0 %vm3063_vm1, %v3062_v6 }
 0x768   : > { %2521 = vmatmul.mubr.msk.bf16.vlgmr.msra.gmra.mrb[20].mxu1 %vm505_vm0, %v1128_v7 }
 0x769   : > { %2532 = vmatprep.mubr.msk.bf16.mxu1 %vm3063_vm1, %v3062_v6 }
 0x831   : > { %v3519_v8 = vpop.f32.mrb[16].mxu0 }
 0x832   : > { %v2504_v9 = vpop.f32.mrb[17].mxu0 }
 0x833   : > { %v1025_v10 = vpop.f32.mrb[18].mxu0  ;;  %v3521_v11 = vpop.f32.mrb[16].mxu1 }
 0x834   : > { %v1076_v12 = vpack.c.bf16 %v3521_v11, %v3519_v8  ;;  %v2505_v13 = vpop.f32.mrb[19].mxu0  ;;  %v2510_v14 = vpop.f32.mrb[17].mxu1 }
 0x835   : > { %v1073_v15 = vpop.f32.mrb[18].mxu1 }
 0x836   : > { %v2511_v16 = vpop.f32.mrb[19].mxu1 }
 0x839   : > { %v1121_v18 = vpop.f32.mrb[20].mxu0 }
 0x83a   : > { %v2516_v19 = vpop.f32.mrb[21].mxu0  ;;  %v1177_v20 = vsel %vm505_vm0, %v1121_v18, -inf }
 0x83b   : > { %v1171_v22 = vpop.f32.mrb[20].mxu1  ;;  %1178 = vmax.xlane.f32.xlu0 %v1177_v20  ;;  %v1124_v24 = vpop.f32.mrb[22].mxu0 }
 0x83c   : > { %v2517_v25 = vpop.f32.mrb[23].mxu0  ;;  %v2522_v27 = vpop.f32.mrb[21].mxu1  ;;  %v1180_v28 = vsel %vm505_vm0, %v1171_v22, -inf }
 0x83d   : > { %1181 = vmax.xlane.f32.xlu1 %v1180_v28  ;;  %v1174_v29 = vpop.f32.mrb[22].mxu1 }
 0x83e   : > { %v2523_v30 = vpop.f32.mrb[23].mxu1 }
 0x84e   : > { %1249 = vrot.lane.b32.xlu1 %v3473_v26, %s3068_s16 }
 0x852   : > { %1394 = vrot.lane.b32.xlu1 %v3471_v23, %s3069_s20 }
 0x856   : > { %1444 = vrot.lane.b32.xlu1 %v3473_v26, %s3069_s20 }
 0x85a   : > { %1442 = vrot.lane.b32.xlu1 %v3473_v26, %s3070_s19 }
 0x8c8   : > { %v1179_v31 = vpop.xlane.xlu0 %1178 }
 0x8c9   : > { %v1183_v32 = vsub.f32 %v1121_v18, %v1179_v31 }
 0x8ca   : > { %v1182_v33 = vpop.xlane.xlu1 %1181 }
 0x8cb   : > { %v1185_v34 = vmul.f32 1.442695, %v1183_v32  ;;  %v1184_v35 = vsub.f32 %v1171_v22, %v1182_v33 }
 0x8cd   : > { %2770 = vpow2.f32 %v1185_v34  ;;  %v1187_v36 = vmul.f32 1.442695, %v1184_v35 }
 0x8ce   : > { %v1250_v37 = vpop.permute.xlu1 %1249 }
 0x8cf   : > { %2772 = vpow2.f32 %v1187_v36  ;;  %v1255_v38 = vsel %vm545_vm3, %v1250_v37, 0 }
 0x8d0   : > { %2531 = vmatpush3.bf16.msra.mxu1 %v1255_v38 }
 0x8d1   : > { %2542 = vmatprep.subr.bf16.mxu1 %v3062_v6 }
 0x8d2   : > { %v1395_v57 = vpop.permute.xlu1 %1394 }
 0x8d3   : > { %v1400_v8 = vsel %vm505_vm0, %v1395_v57, 0 }
 0x8d6   : > { %v1445_v58 = vpop.permute.xlu1 %1444 }
 0x8d7   : > { %v2771_v39 = vpop.eup %2770  ;;  %v1450_v59 = vsel %vm505_vm0, %v1445_v58, 0 }
 0x8d8   : > { %v1189_v40 = vsel %vm505_vm0, %v2771_v39, 0.0 }
 0x8d9   : > { %v2773_v41 = vpop.eup %2772  ;;  %1190 = vadd.xlane.f32.xlu0 %v1189_v40 }
 0x8da   : > { %v1192_v42 = vsel %vm505_vm0, %v2773_v41, 0.0  ;;  %v1443_v60 = vpop.permute.xlu1 %1442 }
 0x8dd   : > { %1193 = vadd.xlane.f32.xlu0 %v1192_v42 }
 0x8f3   : > { %1201 = vrot.lane.b32.xlu0 %v3471_v23, %s3068_s16  ;;  %s2978_s16 = scalar_lea.vmem %s2977_s18, 512 }
 0x8f7   : > { %1392 = vrot.lane.b32.xlu0 %v3471_v23, %s3070_s19  ;;  %s2335_s19 = sshll.u32 %s3374_s23, 4 }
 0x966   : > { %v1191_v43 = vpop.xlane.xlu0 %1190 }
 0x967   : > { %2774 = vrcp.f32 %v1191_v43 }
 0x96a   : > { %v1194_v44 = vpop.xlane.xlu0 %1193 }
 0x96b   : > { %2776 = vrcp.f32 %v1194_v44 }
 0x96e   : > { %v1202_v45 = vpop.permute.xlu0 %1201 }
 0x96f   : > { %v1207_v46 = vsel %vm545_vm3, %v1202_v45, 0 }
 0x970   : > { %2525 = vmatpush3.bf16.msra.mxu0 %v1207_v46 }
 0x971   : > { %v2775_v47 = vpop.eup %2774  ;;  %2536 = vmatprep.subr.bf16.mxu0 %v3062_v6 }
 0x972   : > { %v1196_v49 = vmul.f32 %v2775_v47, %v2771_v39 }
 0x974   : > { %v1199_v50 = vpack.c.bf16 %v1196_v49, %v1196_v49 }
 0x975   : > { %v2777_v52 = vpop.eup %2776 }
 0x976   : > { %v1198_v54 = vmul.f32 %v2777_v52, %v2773_v41  ;;  %2527 = vmatmul.mubr.msk.bf16.vlgmr.msra.gmra.mrb[24].mxu0 %vm505_vm0, %v1199_v50 }
 0x977   : > { %2537 = vmatpush3.bf16.msra.mxu0 %v1302_v51  ;;  %2538 = vmatprep.mubr.msk.bf16.mxu0 %vm3063_vm1, %v3062_v6 }
 0x978   : > { %v1200_v55 = vpack.c.bf16 %v1198_v54, %v1198_v54  ;;  %2548 = vmatprep.subr.bf16.mxu0 %v3062_v6 }
 0x97a   : > { %2533 = vmatmul.mubr.msk.bf16.vlgmr.msra.gmra.mrb[24].mxu1 %vm505_vm0, %v1200_v55 }
 0x97b   : > { %2543 = vmatpush3.bf16.msra.mxu1 %v1349_v56  ;;  %2544 = vmatprep.mubr.msk.bf16.mxu1 %vm3063_vm1, %v3062_v6 }
 0x97c   : > { %2554 = vmatprep.subr.bf16.mxu1 %v3062_v6 }
 0x982   : > { %2545 = vmatmul.mubr.msk.bf16.vlgmr.msra.gmra.mrb[28].mxu1 %vm505_vm0, %v1076_v12  ;;  %v1393_v12 = vpop.permute.xlu0 %1392 }
 0x983   : > { %2556 = vmatprep.mubr.msk.bf16.mxu1 %vm3063_vm1, %v3062_v6 }
 0x984   : > { %2555 = vmatpush3.bf16.xpose.msra.mxu1 %v1450_v59 }
 0x985   : > { %2566 = vmatprep.subr.bf16.mxu1 %v3062_v6 }
 0x98b   : > { %2557 = vmatmul.mubr.msk.bf16.vlgmr.msra.gmra.mrb[32].mxu1 %vm505_vm0, %v1443_v60 }
 0x98c   : > { %2568 = vmatprep.mubr.msk.bf16.mxu1 %vm3063_vm1, %v3062_v6 }
 0xa49   : > { %v1243_v61 = vpop.f32.mrb[24].mxu0 }
 0xa4a   : > { %v2528_v62 = vpop.f32.mrb[25].mxu0 }
 0xa4b   : > { %v1246_v63 = vpop.f32.mrb[26].mxu0 }
 0xa4c   : > { %v2529_v0 = vpop.f32.mrb[27].mxu0 }
 0xa4d   : > { %v1291_v1 = vpop.f32.mrb[24].mxu1  ;;  %v487_v0 = vld [vmem:[#allocation8 + $0x8] sm:$0xf] }
 0xa4e   : > { %v1297_v2 = vpack.c.bf16 %v1291_v1, %v1243_v61  ;;  %v2534_v4 = vpop.f32.mrb[25].mxu1  ;;  %v1617_v1 = vsel %vm545_vm3, %v487_v0, 0  ;;  %v1934_v0 = vsub.s32 2, %v3460_v3 }
 0xa4f   : > { %v1294_v7 = vpop.f32.mrb[26].mxu1 }
 0xa50   : > { %v2535_v9 = vpop.f32.mrb[27].mxu1  ;;  %2539 = vmatmul.mubr.msk.bf16.vlgmr.msra.gmra.mrb[28].mxu0 %vm505_vm0, %v1297_v2 }
 0xa51   : > { %2549 = vmatpush3.bf16.xpose.msra.mxu0 %v1400_v8  ;;  %2550 = vmatprep.mubr.msk.bf16.mxu0 %vm3063_vm1, %v3062_v6 }
 0xa52   : > { %2560 = vmatprep.subr.bf16.mxu0 %v3062_v6 }
 0xa55   : > { %v1385_v10 = vpop.f32.mrb[28].mxu1 }
 0xa56   : > { %v2546_v11 = vpop.f32.mrb[29].mxu1 }
 0xa57   : > { %v1388_v13 = vpop.f32.mrb[30].mxu1 }
 0xa58   : > { %v2547_v14 = vpop.f32.mrb[31].mxu1  ;;  %2551 = vmatmul.mubr.msk.bf16.vlgmr.msra.gmra.mrb[32].mxu0 %vm505_vm0, %v1393_v12 }
 0xa59   : > { %2562 = vmatprep.mubr.msk.bf16.mxu0 %vm3063_vm1, %v3062_v6 }
 0xa5e   : > { %v1486_v15 = vpop.f32.mrb[32].mxu1 }
 0xa5f   : > { %v2558_v16 = vpop.f32.mrb[33].mxu1  ;;  %v1495_v18 = vsel %vm505_vm0, %v1486_v15, -inf }
 0xa60   : > { %1496 = vmax.xlane.f32.xlu1 %v1495_v18  ;;  %v1489_v19 = vpop.f32.mrb[34].mxu1 }
 0xa61   : > { %v2559_v20 = vpop.f32.mrb[35].mxu1 }
 0xa71   : > { %1564 = vrot.lane.b32.xlu1 %v3473_v26, %s3071_s21 }
 0xa75   : > { %1664 = vrot.lane.b32.xlu1 %v3471_v23, %s3072_s24 }
 0xa79   : > { %1714 = vrot.lane.b32.xlu1 %v3473_v26, %s3072_s24  ;;  %s455_s24 = scalar_lea.vmem [#allocation13], %s2335_s19 }
 0xa7d   : > { %1712 = vrot.lane.b32.xlu1 %v3473_v26, %s3073_s9 }
 0xaed   : > { %v1497_v22 = vpop.xlane.xlu1 %1496 }
 0xaee   : > { %v1499_v27 = vsub.f32 %v1486_v15, %v1497_v22 }
 0xaf0   : > { %v1502_v28 = vmul.f32 1.442695, %v1499_v27 }
 0xaf1   : > { %v1565_v24 = vpop.permute.xlu1 %1564 }
 0xaf2   : > { %v1570_v25 = vsel %vm545_vm3, %v1565_v24, 0  ;;  %2778 = vpow2.f32 %v1502_v28 }
 0xaf3   : > { %2567 = vmatpush3.bf16.msra.mxu1 %v1570_v25 }
 0xaf4   : > { %2578 = vmatprep.subr.bf16.mxu1 %v3062_v6 }
 0xaf5   : > { %v1665_v50 = vpop.permute.xlu1 %1664 }
 0xaf6   : > { %v1670_v52 = vsel %vm505_vm0, %v1665_v50, 0 }
 0xafc   : > { %v2779_v38 = vpop.eup %2778 }
 0xafd   : > { %v1507_v41 = vsel %vm505_vm0, %v2779_v38, 0.0 }
 0xb23   : > { %v1338_v29 = vpop.f32.mrb[28].mxu0 }
 0xb24   : > { %v3577_v30 = vadd.f32 %v1385_v10, %v1338_v29  ;;  %v2540_v31 = vpop.f32.mrb[29].mxu0  ;;  %v1715_v10 = vpop.permute.xlu1 %1714 }
 0xb25   : > { %v1341_v32 = vpop.f32.mrb[30].mxu0  ;;  %v1720_v15 = vsel %vm505_vm0, %v1715_v10, 0 }
 0xb26   : > { %v3579_v33 = vadd.f32 %v1388_v13, %v1341_v32  ;;  %v2541_v34 = vpop.f32.mrb[31].mxu0 }
 0xb28   : > { %v1713_v18 = vpop.permute.xlu1 %1712 }
 0xb2b   : > { %v1436_v35 = vpop.f32.mrb[32].mxu0 }
 0xb2c   : > { %v2552_v36 = vpop.f32.mrb[33].mxu0  ;;  %v1492_v37 = vsel %vm505_vm0, %v1436_v35, -inf }
 0xb2d   : > { %1493 = vmax.xlane.f32.xlu0 %v1492_v37  ;;  %v1439_v39 = vpop.f32.mrb[34].mxu0 }
 0xb2e   : > { %v2553_v40 = vpop.f32.mrb[35].mxu0 }
 0xb31   : > { %1508 = vadd.xlane.f32.xlu0 %v1507_v41 }
 0xbba   : > { %v1494_v42 = vpop.xlane.xlu0 %1493 }
 0xbbb   : > { %v1498_v43 = vsub.f32 %v1436_v35, %v1494_v42 }
 0xbbd   : > { %v1500_v44 = vmul.f32 1.442695, %v1498_v43 }
 0xbbe   : > { %v1509_v45 = vpop.xlane.xlu0 %1508 }
 0xbbf   : > { %2780 = vpow2.f32 %v1500_v44 }
 0xbc0   : > { %2782 = vrcp.f32 %v1509_v45 }
 0xbc9   : > { %v2781_v46 = vpop.eup %2780 }
 0xbca   : > { %v2783_v47 = vpop.eup %2782  ;;  %v1504_v48 = vsel %vm505_vm0, %v2781_v46, 0.0 }
 0xbcb   : > { %v1513_v49 = vmul.f32 %v2783_v47, %v2779_v38  ;;  %1505 = vadd.xlane.f32.xlu0 %v1504_v48 }
 0xbcd   : > { %v1515_v51 = vpack.c.bf16 %v1513_v49, %v1513_v49 }
 0xbcf   : > { %2569 = vmatmul.mubr.msk.bf16.vlgmr.msra.gmra.mrb[36].mxu1 %vm505_vm0, %v1515_v51 }
 0xbd0   : > { %2579 = vmatpush3.bf16.xpose.msra.mxu1 %v1670_v52  ;;  %2580 = vmatprep.mubr.msk.bf16.mxu1 %vm3063_vm1, %v3062_v6 }
 0xbd1   : > { %2590 = vmatprep.subr.bf16.mxu1 %v3062_v6 }
 0xbe1   : > { %1516 = vrot.lane.b32.xlu0 %v3471_v23, %s3071_s21  ;;  %s2385_s21 = sshll.u32 %s3149_s15, 8  ;;  %s2159_s15 = scalar_lea.sflag [#allocation4], %s3374_s23 }
 0xbe2   : > { %s3678_s17 = scalar_lea.hbm %s3760_s27, %s2385_s21 }
 0xbe5   : > { %1662 = vrot.lane.b32.xlu0 %v3471_v23, %s3073_s9  ;;  %s2172_s9 = sshll.u32 %s455_s24, 4  ;;  %s3680_s9 = int_to_ptr.vmem [resolvable:$true] %s2172_s9 }
 0xbe6   : > { %s2972_s3 = scalar_lea.vmem %s3680_s9, 256  ;;  %p2979_p0 = scmp.lt.s32.totalorder %s3680_s9, %s2977_s18 }
 0xbe7   : > { %p2973_p4 = scmp.ne.s32.totalorder %s3680_s9, %s2972_s3  ;;  %p2980_p2 = scmp.lt.s32.totalorder %s2978_s16, %s2972_s3 }
 0xbe9   : > { %p2974_p1 = pnand %p2973_p4, %p3761_p12  ;;  %p2981_p8 = por %p2980_p2, %p2979_p0 }
 0xbeb   : > { %p2975_p13 = pneg %p2974_p1 }
 0xbed   : > { %p2982_p6 = pnand %p2981_p8, %p2975_p13 }
 0xc58   : > { %v1506_v53 = vpop.xlane.xlu0 %1505 }
 0xc59   : > { %2784 = vrcp.f32 %v1506_v53  ;;  %v488_v53 = vld [vmem:[#allocation8 + $0xc] sm:$0xf] }
 0xc5c   : > { %v1517_v54 = vpop.permute.xlu0 %1516 }
 0xc5d   : > { %v1522_v55 = vsel %vm545_vm3, %v1517_v54, 0  ;;  %v1887_v54 = vsel %vm545_vm3, %v488_v53, 0 }
 0xc5e   : > { %2561 = vmatpush3.bf16.msra.mxu0 %v1522_v55 }
 0xc5f   : > { %2572 = vmatprep.subr.bf16.mxu0 %v3062_v6 }
 0xc60   : > { %v1663_v56 = vpop.permute.xlu0 %1662 }
 0xc61   : > { %2581 = vmatmul.mubr.msk.bf16.vlgmr.msra.gmra.mrb[40].mxu1 %vm505_vm0, %v1663_v56 }
 0xc62   : > { %2592 = vmatprep.mubr.msk.bf16.mxu1 %vm3063_vm1, %v3062_v6 }
 0xc63   : > { %v2785_v57 = vpop.eup %2784 }
 0xc64   : > { %v1511_v58 = vmul.f32 %v2785_v57, %v2781_v46 }
 0xc66   : > { %v1514_v59 = vpack.c.bf16 %v1511_v58, %v1511_v58 }
 0xc68   : > { %2563 = vmatmul.mubr.msk.bf16.vlgmr.msra.gmra.mrb[36].mxu0 %vm505_vm0, %v1514_v59 }
 0xc69   : > { %2574 = vmatprep.mubr.msk.bf16.mxu0 %vm3063_vm1, %v3062_v6  ;;  %2573 = vmatpush3.bf16.msra.mxu0 %v1617_v1  ;;  %v1935_v1 = vrot.slane %v3463_v5, %v1934_v0 }
 0xc6a   : > { %2584 = vmatprep.subr.bf16.mxu0 %v3062_v6 }
 0xca2   : > { %v1606_v60 = vpop.f32.mrb[36].mxu1 }
 0xca3   : > { %v2570_v61 = vpop.f32.mrb[37].mxu1 }
 0xca4   : > { %v1609_v62 = vpop.f32.mrb[38].mxu1 }
 0xca5   : > { %v2571_v63 = vpop.f32.mrb[39].mxu1 }
 0xd34   : > { %v1706_v2 = vpop.f32.mrb[40].mxu1 }
 0xd35   : > { %v2582_v4 = vpop.f32.mrb[41].mxu1  ;;  %v1762_v7 = vsel %vm505_vm0, %v1706_v2, -inf }
 0xd36   : > { %1763 = vmax.xlane.f32.xlu0 %v1762_v7  ;;  %v1709_v8 = vpop.f32.mrb[42].mxu1 }
 0xd37   : > { %v2583_v9 = vpop.f32.mrb[43].mxu1 }
 0xd3b   : > { %v1558_v11 = vpop.f32.mrb[36].mxu0 }
 0xd3c   : > { %v1612_v12 = vpack.c.bf16 %v1606_v60, %v1558_v11  ;;  %v2564_v13 = vpop.f32.mrb[37].mxu0 }
 0xd3d   : > { %v1561_v14 = vpop.f32.mrb[38].mxu0 }
 0xd3e   : > { %v2565_v16 = vpop.f32.mrb[39].mxu0  ;;  %2575 = vmatmul.mubr.msk.bf16.vlgmr.msra.gmra.mrb[40].mxu0 %vm505_vm0, %v1612_v12 }
 0xd3f   : > { %2585 = vmatpush3.bf16.xpose.msra.mxu0 %v1720_v15  ;;  %2586 = vmatprep.mubr.msk.bf16.mxu0 %vm3063_vm1, %v3062_v6 }
 0xd40   : > { %2596 = vmatprep.subr.bf16.mxu0 %v3062_v6 }
 0xd46   : > { %2587 = vmatmul.mubr.msk.bf16.vlgmr.msra.gmra.mrb[44].mxu0 %vm505_vm0, %v1713_v18 }
 0xd47   : > { %2598 = vmatprep.mubr.msk.bf16.mxu0 %vm3063_vm1, %v3062_v6 }
 0xdc3   : > { %v1764_v19 = vpop.xlane.xlu0 %1763 }
 0xdc4   : > { %v1768_v20 = vsub.f32 %v1706_v2, %v1764_v19 }
 0xdc6   : > { %v1770_v22 = vmul.f32 1.442695, %v1768_v20 }
 0xdc8   : > { %2786 = vpow2.f32 %v1770_v22 }
 0xdd2   : > { %v2787_v24 = vpop.eup %2786 }
 0xdd3   : > { %v1774_v25 = vsel %vm505_vm0, %v2787_v24, 0.0 }
 0xdd4   : > { %1775 = vadd.xlane.f32.xlu0 %v1774_v25 }
 0xe11   : > { %v1653_v27 = vpop.f32.mrb[40].mxu0 }
 0xe12   : > { %v1660_v28 = vadd.f32 %v1653_v27, %v3577_v30  ;;  %v2576_v29 = vpop.f32.mrb[41].mxu0 }
 0xe13   : > { %v1656_v31 = vpop.f32.mrb[42].mxu0 }
 0xe14   : > { %v1661_v32 = vadd.f32 %v1656_v31, %v3579_v33  ;;  %v2577_v34 = vpop.f32.mrb[43].mxu0  ;;  %v2748_v31 = vld [vmem:[#allocation10] sm:$0xff]  }
 0xe15   : > { %v2751_v34 = vld [vmem:[%s3733_s7 + $0x8] sm:$0xff]  }
 0xe19   : > { %v1756_v35 = vpop.f32.mrb[44].mxu0 }
 0xe1a   : > { %v2588_v36 = vpop.f32.mrb[45].mxu0  ;;  %v1765_v37 = vsel %vm505_vm0, %v1756_v35, -inf }
 0xe1b   : > { %1766 = vmax.xlane.f32.xlu1 %v1765_v37  ;;  %v1759_v38 = vpop.f32.mrb[46].mxu0 }
 0xe1c   : > { %v2589_v39 = vpop.f32.mrb[47].mxu0 }
 0xe2c   : > { %1834 = vrot.lane.b32.xlu1 %v3473_v26, %s3074_s26 }
 0xe61   : > { %v1776_v45 = vpop.xlane.xlu0 %1775 }
 0xea8   : > { %v1767_v40 = vpop.xlane.xlu1 %1766 }
 0xea9   : > { %v1769_v41 = vsub.f32 %v1756_v35, %v1767_v40 }
 0xeab   : > { %v1772_v42 = vmul.f32 1.442695, %v1769_v41  ;;  %v1969_v41 = vsub.s32 3, %v3460_v3 }
 0xeac   : > { %v1835_v43 = vpop.permute.xlu1 %1834 }
 0xead   : > { %2788 = vpow2.f32 %v1772_v42  ;;  %v1840_v30 = vsel %vm545_vm3, %v1835_v43, 0  ;;  %v1970_v42 = vrot.slane %v3463_v5, %v1969_v41  ;;  %v1975_v43 = vsub.s32 4, %v3460_v3 }
 0xeae   : > { %2597 = vmatpush3.bf16.msra.mxu0 %v1840_v30  ;;  %2790 = vrcp.f32 %v1776_v45 }
 0xeaf   : > { %2608 = vmatprep.subr.bf16.mxu0 %v3062_v6 }
 0xeb7   : > { %v2789_v33 = vpop.eup %2788 }
 0xeb8   : > { %v1777_v44 = vsel %vm505_vm0, %v2789_v33, 0.0  ;;  %v2791_v46 = vpop.eup %2790 }
 0xeb9   : > { %1778 = vadd.xlane.f32.xlu0 %v1777_v44  ;;  %v1781_v47 = vmul.f32 %v2791_v46, %v2787_v24 }
 0xebb   : > { %v1784_v50 = vpack.c.bf16 %v1781_v47, %v1781_v47 }
 0xecf   : > { %1786 = vrot.lane.b32.xlu0 %v3471_v23, %s3074_s26 }
 0xf46   : > { %v1779_v26 = vpop.xlane.xlu0 %1778 }
 0xf47   : > { %2792 = vrcp.f32 %v1779_v26  ;;  %v1976_v26 = vrot.slane %v3463_v5, %v1975_v43 }
 0xf4a   : > { %v1787_v48 = vpop.permute.xlu0 %1786 }
 0xf4b   : > { %v1792_v49 = vsel %vm545_vm3, %v1787_v48, 0 }
 0xf4c   : > { %2591 = vmatpush3.bf16.msra.mxu1 %v1792_v49 }
 0xf4d   : > { %2602 = vmatprep.subr.bf16.mxu1 %v3062_v6 }
 0xf4f   : > { %2593 = vmatmul.mubr.msk.bf16.vlgmr.msra.gmra.mrb[44].mxu1 %vm505_vm0, %v1784_v50 }
 0xf50   : > { %2604 = vmatprep.mubr.msk.bf16.mxu1 %vm3063_vm1, %v3062_v6  ;;  %2603 = vmatpush3.bf16.msra.mxu1 %v1887_v54 }
 0xf51   : > { %v2793_v51 = vpop.eup %2792  ;;  %2616 = vmatprep.subr.bf16.mxu1 %v3062_v6 }
 0xf52   : > { %v1783_v23 = vmul.f32 %v2793_v51, %v2789_v33  ;;  %v2752_v51 = vld [vmem:[%s3733_s7 + $0x10] sm:$0xff]  }
 0xf54   : > { %v1785_v52 = vpack.c.bf16 %v1783_v23, %v1783_v23  ;;  %v2753_v23 = vld [vmem:[%s3733_s7 + $0x18] sm:$0xff]  }
 0xf56   : > { %2599 = vmatmul.mubr.msk.bf16.vlgmr.msra.gmra.mrb[48].mxu0 %vm505_vm0, %v1785_v52  ;;  %v1982_v52 = vsub.s32 5, %v3460_v3 }
 0xf57   : > { %2612 = vmatprep.mubr.msk.bf16.mxu0 %vm3063_vm1, %v3062_v6  ;;  %2609 = vmatpush3.bf16.msra.mxu0 %v2748_v31 }
 0xf58   : > { %2610 = vmatprep.subr.bf16.mxu0 %v3062_v6  ;;  %v1983_v53 = vrot.slane %v3463_v5, %v1982_v52 }
0x1022   : > { %v1828_v55 = vpop.f32.mrb[44].mxu1 }
0x1023   : > { %v2594_v56 = vpop.f32.mrb[45].mxu1 }
0x1024   : > { %v1831_v57 = vpop.f32.mrb[46].mxu1 }
0x1025   : > { %v2595_v58 = vpop.f32.mrb[47].mxu1 }
0x1029   : > { %v1876_v59 = vpop.f32.mrb[48].mxu0 }
0x102a   : > { %v1882_v60 = vpack.c.bf16 %v1876_v59, %v1828_v55  ;;  %v2600_v61 = vpop.f32.mrb[49].mxu0 }
0x102b   : > { %v1879_v62 = vpop.f32.mrb[50].mxu0 }
0x102c   : > { %v2601_v63 = vpop.f32.mrb[51].mxu0  ;;  %2605 = vmatmul.mubr.msk.bf16.vlgmr.msra.gmra.mrb[48].mxu1 %vm505_vm0, %v1882_v60 }
0x102d   : > { %2624 = vmatprep.mubr.msk.bf16.mxu1 %vm3063_vm1, %v3062_v6 }
0x10ff   : > { %v1923_v2 = vpop.f32.mrb[48].mxu1 }
0x1100   : > { %v1930_v4 = vadd.f32 %v1923_v2, %v1660_v28  ;;  %v2606_v7 = vpop.f32.mrb[49].mxu1 }
0x1101   : > { %v1926_v8 = vpop.f32.mrb[50].mxu1 }
0x1102   : > { %v1936_v9 = vadd.f32 %v1935_v1, %v1930_v4  ;;  %v1931_v10 = vadd.f32 %v1926_v8, %v1661_v32  ;;  %v2607_v11 = vpop.f32.mrb[51].mxu1  ;;  %v2750_v32 = vld [vmem:[%s3733_s7] sm:$0xff]  }
0x1103   : > { %2617 = vmatpush3.bf16.msra.mxu1 %v2750_v32  ;;  %v2146_v32 = vsub.s32 7, %v3460_v3 }
0x1104   : > { %v1937_v12 = vadd.f32 %v1935_v1, %v1931_v10  ;;  %v1938_v13 = vadd.f32 %v1936_v9, %v3421_v17  ;;  %2618 = vmatprep.subr.bf16.mxu1 %v3062_v6 }
0x1106   : > { %v1940_v14 = vsel %vm750_vm7, %v1938_v13, 0.0  ;;  %v1939_v15 = vadd.f32 %v1937_v12, %v3427_v21  ;;  %v2749_v21 = vld [vmem:[#allocation10 + $0x8] sm:$0xff]  }
0x1107   : > { %1941 = vadd.xlane.f32.xlu1 %v1940_v14  ;;  %2611 = vmatpush3.bf16.msra.mxu0 %v2749_v21 }
0x1108   : > { %v1943_v16 = vsel %vm750_vm7, %v1939_v15, 0.0  ;;  %2619 = vmatpush3.bf16.msra.mxu1 %v2751_v34  ;;  %v2147_v34 = vrot.slane %v3463_v5, %v2146_v32 }
0x1109   : > { %1944 = vadd.xlane.f32.xlu0 %v1943_v16  ;;  %2620 = vmatprep.subr.bf16.mxu1 %v3062_v6 }
0x110c   : > { %2621 = vmatpush3.bf16.msra.mxu1 %v2752_v51 }
0x110d   : > { %2622 = vmatprep.subr.bf16.mxu1 %v3062_v6  ;;  %v2045_v6 = vsub.s32 6, %v3460_v3 }
0x110f   : > { %v2046_v63 = vrot.slane %v3463_v5, %v2045_v6 }
0x1110   : > { %2623 = vmatpush3.bf16.msra.mxu1 %v2753_v23 }
0x1194   : > { %v1942_v18 = vpop.xlane.xlu1 %1941 }
0x1195   : > { %v1947_v19 = vmul.f32 0.03125, %v1942_v18 }
0x1196   : > { %v1945_v20 = vpop.xlane.xlu0 %1944 }
0x1197   : > { %v1949_v22 = vsub.f32 %v1938_v13, %v1947_v19  ;;  %v1948_v24 = vmul.f32 0.03125, %v1945_v20 }
0x1199   : > { %v1950_v25 = vsub.f32 %v1939_v15, %v1948_v24  ;;  %v1951_v27 = vmul.f32 %v1949_v22, %v1949_v22 }
0x119b   : > { %v1953_v28 = vsel %vm750_vm7, %v1951_v27, 0.0  ;;  %v1952_v29 = vmul.f32 %v1950_v25, %v1950_v25 }
0x119c   : > { %1954 = vadd.xlane.f32.xlu0 %v1953_v28 }
0x119d   : > { %v1956_v17 = vsel %vm750_vm7, %v1952_v29, 0.0 }
0x119e   : > { %1957 = vadd.xlane.f32.xlu1 %v1956_v17 }
0x1229   : > { %v1955_v35 = vpop.xlane.xlu0 %1954 }
0x122a   : > { %v1959_v36 = vmul.f32 0.03125, %v1955_v35 }
0x122b   : > { %v1958_v37 = vpop.xlane.xlu1 %1957 }
0x122c   : > { %v1961_v38 = vadd.f32 1e-05, %v1959_v36  ;;  %v1960_v39 = vmul.f32 0.03125, %v1958_v37 }
0x122e   : > { %2794 = vrsqrt.f32 %v1961_v38  ;;  %v1962_v40 = vadd.f32 1e-05, %v1960_v39  ;;  %v2378_v38 = vld [vmem:[#allocation11 + $0x8] ss:$0 sm:$0xff] }
0x1230   : > { %2796 = vrsqrt.f32 %v1962_v40 }
0x1238   : > { %v2795_v30 = vpop.eup %2794 }
0x1239   : > { %v1965_v33 = vmul.f32 %v2795_v30, %v1949_v22 }
0x123a   : > { %v2797_v44 = vpop.eup %2796 }
0x123b   : > { %v1971_v45 = vmul.f32 %v1970_v42, %v1965_v33  ;;  %v1966_v46 = vmul.f32 %v2797_v44, %v1950_v25 }
0x123d   : > { %v1972_v47 = vmul.f32 %v1970_v42, %v1966_v46  ;;  %v1977_v48 = vadd.f32 %v1976_v26, %v1971_v45 }
0x123f   : > { %v1978_v49 = vadd.f32 %v1976_v26, %v1972_v47 }
0x1241   : > { %v1979_v50 = vpack.c.bf16 %v1978_v49, %v1977_v48 }
0x1243   : > { %2613 = vmatmul.mubr.msk.bf16.vlgmr.msra.gmra.mrb[52].mxu0 %vm750_vm7, %v1979_v50 }
0x1316   : > { %v2033_v54 = vpop.f32.mrb[52].mxu0 }
0x1317   : > { %v2034_v55 = vadd.f32 %v2033_v54, %v1983_v53  ;;  %v2614_v56 = vpop.f32.mrb[53].mxu0 }
0x1318   : > { %v2036_v57 = vpop.f32.mrb[54].mxu0 }
0x1319   : > { %v2037_v58 = vadd.f32 %v2036_v57, %v1983_v53  ;;  %v2615_v59 = vpop.f32.mrb[55].mxu0  ;;  %v2040_v60 = vmax.f32 %v2034_v55, 0.0 }
0x131b   : > { %v2041_v61 = vmax.f32 %v2037_v58, 0.0 }
0x131d   : > { %v2042_v62 = vpack.c.bf16 %v2041_v61, %v2040_v60 }
0x131f   : > { %2625 = vmatmul.mubr.msk.bf16.vlgmr.msra.gmra.mrb[52].mxu1 %vm2071_vm8, %v2042_v62 }
0x13f2   : > { %v2109_v0 = vpop.f32.mrb[52].mxu1 }
0x13f3   : > { %v2110_v1 = vadd.f32 %v2109_v0, %v2046_v63  ;;  %v2626_v2 = vpop.f32.mrb[53].mxu1 }
0x13f4   : > { %v2112_v4 = vpop.f32.mrb[54].mxu1 }
0x13f5   : > { %v2113_v7 = vadd.f32 %v2112_v4, %v2046_v63  ;;  %v2627_v8 = vpop.f32.mrb[55].mxu1  ;;  %v2116_v9 = vadd.f32 %v2110_v1, %v1977_v48 }
0x13f7   : > { %v2118_v10 = vsel %vm750_vm7, %v2116_v9, 0.0  ;;  %v2117_v11 = vadd.f32 %v2113_v7, %v1978_v49 }
0x13f8   : > { %2119 = vadd.xlane.f32.xlu0 %v2118_v10 }
0x13f9   : > { %v2121_v12 = vsel %vm750_vm7, %v2117_v11, 0.0 }
0x13fa   : > { %2122 = vadd.xlane.f32.xlu1 %v2121_v12 }
0x1485   : > { %v2120_v13 = vpop.xlane.xlu0 %2119 }
0x1486   : > { %v2124_v14 = vmul.f32 0.03125, %v2120_v13 }
0x1487   : > { %v2123_v15 = vpop.xlane.xlu1 %2122 }
0x1488   : > { %v2126_v16 = vsub.f32 %v2116_v9, %v2124_v14  ;;  %v2125_v18 = vmul.f32 0.03125, %v2123_v15 }
0x148a   : > { %v2127_v19 = vsub.f32 %v2117_v11, %v2125_v18  ;;  %v2128_v20 = vmul.f32 %v2126_v16, %v2126_v16 }
0x148c   : > { %v2130_v22 = vsel %vm750_vm7, %v2128_v20, 0.0  ;;  %v2129_v24 = vmul.f32 %v2127_v19, %v2127_v19 }
0x148d   : > { %2131 = vadd.xlane.f32.xlu0 %v2130_v22 }
0x148e   : > { %v2133_v25 = vsel %vm750_vm7, %v2129_v24, 0.0 }
0x148f   : > { %2134 = vadd.xlane.f32.xlu1 %v2133_v25 }
0x151a   : > { %v2132_v27 = vpop.xlane.xlu0 %2131 }
0x151b   : > { %v2136_v28 = vmul.f32 0.03125, %v2132_v27 }
0x151c   : > { %v2135_v29 = vpop.xlane.xlu1 %2134 }
0x151d   : > { %v2138_v17 = vadd.f32 1e-05, %v2136_v28  ;;  %v2137_v31 = vmul.f32 0.03125, %v2135_v29 }
0x151f   : > { %2798 = vrsqrt.f32 %v2138_v17  ;;  %v2139_v21 = vadd.f32 1e-05, %v2137_v31 }
0x1521   : > { %2800 = vrsqrt.f32 %v2139_v21 }
0x1529   : > { %v2799_v35 = vpop.eup %2798 }
0x152a   : > { %v2142_v36 = vmul.f32 %v2799_v35, %v2126_v16 }
0x152b   : > { %v2801_v37 = vpop.eup %2800 }
0x152c   : > { %v2148_v39 = vmul.f32 %v2147_v34, %v2142_v36  ;;  %v2143_v40 = vmul.f32 %v2801_v37, %v2127_v19 }
0x152e   : > { %v2154_v41 = vadd.f32 %v2378_v38, %v2148_v39  ;;  %v2149_v42 = vmul.f32 %v2147_v34, %v2143_v40 }
0x1530   : > { %v2155_v3 = vadd.f32 %v2378_v38, %v2149_v42  ;;  %2156 = vst.msk [vmem:[%s455_s24] sm:$0xff] %vm750_vm7, %v2154_v41 }
0x1532   : > { %2157 = vst.msk [vmem:[%s455_s24 + $0x8] sm:$0xff] %vm750_vm7, %v2155_v3 }
0x1533   : > { %2985 = shalt.err (!%p2982_p6)
}
0x1534   : > { %s2986_s20 = scalar_lea.hbm %s3678_s17, 256  ;;  %s2990_s24 = scalar_lea.hbm %s3760_s27, 512 }
0x1535   : > { %p2987_p10 = scmp.ne.s32.totalorder %s3678_s17, %s2986_s20  ;;  %p2991_p5 = scmp.lt.u32.totalorder %s3678_s17, %s3760_s27 }
0x1536   : > { %p2992_p9 = scmp.lt.u32.totalorder %s2990_s24, %s2986_s20  ;;  %p2994_p4 = scmp.lt.u32.totalorder %s2986_s20, %s3678_s17 }
0x1537   : > { %p2988_p11 = pnand %p2987_p10, %p3761_p12 }
0x1538   : > { %p2993_p7 = por %p2992_p9, %p2991_p5 }
0x1539   : > { %p2989_p3 = pneg %p2988_p11 }
0x153a   : > { %p2995_p1 = por %p2994_p4, %p2993_p7 }
0x153c   : > { %p2996_p13 = pnand %p2995_p1, %p2989_p3 }
0x153e   : > { %2999 = shalt.err (!%p2996_p13)
}
0x153f   : > { %s3076_s3 = smov 128   ;;  %s3077_s29 = smov 8  }
0x1540   : > { %2650 = dma.vmem_to_hbm [thread:$0]  (%p3761_p12), %s3680_s9, 256, %s3678_s17, %s2159_s15, %s3076_s3, %s3076_s3, %s3077_s29  }
0x1541 PF: > { %s2187_s18 = sand.u32 1, %s3038_s30   ;;  %p3762_p0 = scmp.ne.s32.totalorder %s3750_s13, 0 }
0x1542   : > { %p3763_p2 = scmp.ge.s32.totalorder %s3050_s12, 2  ;;  %s2188_s16 = scalar_lea.sflag [#allocation4], %s2187_s18 }
0x1544   : > { %p2673_p8 = pnand %p3763_p2, %p3762_p0 }
0x1546   : > { %3033 = dma.done.wait (!%p2673_p8), %s2188_s16, 256  }
0x1547   : > { %3035 = vsyncadd (!%p2673_p8), %s2188_s16, 4294967040  ;;  %p25_p6 = scmp.ge.s32.totalorder %s3298_s22, 4   ;;  %s3764_s30 = smov %s3042_s10 }
0x1548   : > { %s3765_s10 = smov %s3046_s11  ;;  %s3766_s11 = smov %s3310_s28 }
0x1549   : > { %s3767_s12 = smov %s3298_s22  ;;  %27 = sbr.rel (!%p25_p6) target bundleno = 11 (0xb), region = 127 }
0x1550   :  { %2193 = vsyncpa [#allocation3], 1 }
0x1551   :  { %2195 = vsyncpa [#allocation3 + $0x1], 1 }
0x1552   :  { %2196 = vsyncpa [#allocation6], 1 }
0x1553   :  { %2197 = vsyncpa [#allocation9], 1 }
0x1554   :  { %2198 = vsyncpa [#allocation12], 1 }
0x1555   :  { %2199 = vsyncpa [#allocation4], 1 }
0x1556   :  { %2201 = vsyncpa [#allocation4 + $0x1], 1 }

</bundles_post_ra>
